<compile_context>
chip_gen: v7x
topology: tpu7x:2x2x1
jax: 0.10.0
libtpu: 0.0.40
codegen_flags: <defaults>
</compile_context>

<pallas_src>
import jax
import jax.numpy as jnp
from jax import lax
from jax.experimental import pallas as pl
from jax.experimental.pallas import tpu as pltpu

# keep the pure-JAX reference numerically comparable to the in-kernel f32 dots
jax.config.update("jax_default_matmul_precision", "highest")

# ---- small synthetic config (mirrors NeurocacheConfig fields) ----
B, S, H = 2, 8, 32          # batch, segment length, hidden size
COMPRESSION = 4             # compression_factor
DC = H // COMPRESSION       # compressed cache dim = 8
CACHE = 64                  # cache_size (small synthetic)
TOPK = 4                    # retrieved neighbors per token
DH = 16                     # retrieval-attention head dim


def _neurocache_kernel(off_ref, h_ref, cache_ref, w_in_ref, w_out_ref,
                       out_ref, cache_out_ref):
    # off_ref (SMEM scalar prefetch) is consumed by the index_maps: it places
    # the circular-buffer writeback block. Not needed in the body.
    del off_ref

    # fused shared-LHS projection: cols [0:DC] = h@wc, cols [DC:2DC] = h@(wq wk^T)
    proj = jnp.dot(h_ref[...], w_in_ref[...],
                   preferred_element_type=jnp.float32)            # (S, 2*DC)
    c_b = proj[:, :DC]                                            # compressed keys
    qk_b = proj[:, DC:]                                           # q @ wk^T

    # circular-buffer cache update: write ONLY the S new compressed rows; the
    # out BlockSpec (dynamic index from the prefetched pointer) turns this into
    # a single auto-pipelined DMA overlapped with the rest of the step.
    cache_out_ref[...] = c_b

    cache_b = cache_ref[...]                                      # (CACHE, DC)

    # similarity + retrieval-attention scores: two direct dot_generals on the
    # column views (no sublane concat — two tiny MXU pushes beat a relayout).
    sim = lax.dot_general(c_b, cache_b, (((1,), (1,)), ((), ())),
                          preferred_element_type=jnp.float32)     # (S, CACHE)
    qk_sc = lax.dot_general(qk_b, cache_b, (((1,), (1,)), ((), ())),
                            preferred_element_type=jnp.float32)   # (S, CACHE)

    # exact top-k selection (first-occurrence argmax, -inf masking)
    # TODO(synk): at production CACHE fuse max + first-occurrence into one XLU
    # reduction via a packed sortable key (changes tie-breaking vs f32 ref).
    iota = lax.broadcasted_iota(jnp.int32, (S, CACHE), 1)
    s_work = sim
    onehots = []
    for _ in range(TOPK):
        m = jnp.max(s_work, axis=-1, keepdims=True)               # (S, 1)
        first = jnp.min(jnp.where(s_work >= m, iota, CACHE),
                        axis=-1, keepdims=True)
        oh = (iota == first).astype(jnp.float32)                  # (S, CACHE)
        onehots.append(oh)
        s_work = jnp.where(oh > 0.0, -jnp.inf, s_work)

    # deferred logit extraction (after the selection loop: frees VPU/XLU slots
    # in the loop that saturates at large CACHE)
    scale = 1.0 / (DH ** 0.5)
    logits = [jnp.sum(oh * qk_sc, axis=-1, keepdims=True) * scale
              for oh in onehots]

    # softmax over K kept as K separate (S,1) columns (no lane-axis concat)
    lm = logits[0]
    for l in logits[1:]:
        lm = jnp.maximum(lm, l)
    exps = [jnp.exp(l - lm) for l in logits]
    denom = exps[0]
    for e in exps[1:]:
        denom = denom + e
    inv = pl.reciprocal(denom, approx=True)                       # EUP slot

    # rbar = sum_i p_i * r_i == (sum_i p_i * onehot_i) @ cache : one matmul
    wmask = (exps[0] * inv) * onehots[0]
    for i in range(1, TOPK):
        wmask = wmask + (exps[i] * inv) * onehots[i]
    rbar = jnp.dot(wmask, cache_b, preferred_element_type=jnp.float32)  # (S, DC)

    # residual add; wv/wo folded into one (DC, H) matrix. h_ref is re-read so
    # its live range does not span the whole body at production S*H.
    out_ref[...] = h_ref[...] + jnp.dot(rbar, w_out_ref[...],
                                        preferred_element_type=jnp.float32)


def neurocache_forward(h, cache, params, start_of_sequence, write_offset):
    """Equivalent of NeurocacheModel.forward(..., start_of_sequence=sos):
    optionally resets the per-sequence cache, runs the neurocache-augmented
    segment forward, and returns (hidden_out, updated_cache). The cache is
    updated in place (circular buffer at `write_offset`, assumed a multiple of
    the segment length S) via input_output_aliases."""
    # reset_sequence_cache: zero cache rows where a new sequence starts (glue)
    cache = jnp.where(start_of_sequence[:, None, None], 0.0, cache)

    # pack the shared-LHS / shared-RHS trainable weights (tiny host matmuls)
    w_in = jnp.concatenate(
        [params["wc"], jnp.dot(params["wq"], params["wk"].T)], axis=1)  # (H, 2*DC)
    w_out = jnp.dot(params["wv"], params["wo"])                         # (DC, H)

    # circular write pointer in units of S-row blocks, wrapped modulo CACHE
    off_blk = ((jnp.asarray(write_offset, jnp.int32) % CACHE) // S).reshape(1)

    cost = pl.CostEstimate(
        flops=(2 * B * S * H * 2 * DC            # fused projection
               + 2 * 2 * B * S * DC * CACHE      # sim + q.k score matmuls
               + 2 * B * S * CACHE * DC          # weighted one-hot gather
               + 2 * B * S * DC * H),            # output projection
        transcendentals=B * S * (TOPK + 1),
        bytes_accessed=4 * (2 * B * S * H + B * CACHE * DC + B * S * DC
                            + H * 2 * DC + DC * H),
    )

    grid_spec = pltpu.PrefetchScalarGridSpec(
        num_scalar_prefetch=1,                   # circular write pointer
        grid=(B,),                               # one batch per step
        in_specs=[
            pl.BlockSpec((None, S, H), lambda b, off: (b, 0, 0)),        # h
            pl.BlockSpec((None, CACHE, DC), lambda b, off: (b, 0, 0)),   # cache
            pl.BlockSpec((H, 2 * DC), lambda b, off: (0, 0)),            # w_in
            pl.BlockSpec((DC, H), lambda b, off: (0, 0)),                # w_out
        ],
        out_specs=(
            pl.BlockSpec((None, S, H), lambda b, off: (b, 0, 0)),        # hidden out
            pl.BlockSpec((None, S, DC), lambda b, off: (b, off[0], 0)),  # new rows
        ),
    )

    out, new_cache = pl.pallas_call(
        _neurocache_kernel,
        grid_spec=grid_spec,
        out_shape=(jax.ShapeDtypeStruct((B, S, H), jnp.float32),
                   jax.ShapeDtypeStruct((B, CACHE, DC), jnp.float32)),
        # cache (operand index 2, counting the scalar-prefetch arg) aliases the
        # updated-cache output: only the fresh S rows per batch are rewritten.
        input_output_aliases={2: 1},
        compiler_params=pltpu.CompilerParams(
            dimension_semantics=("parallel",)),
        cost_estimate=cost,
    )(off_blk, h, cache, w_in, w_out)

    return out, new_cache


def _reference(h, cache, params, sos, off):
    """Pure-JAX reference for correctness checking."""
    cache = jnp.where(sos[:, None, None], 0.0, cache)
    c = h @ params["wc"]                                     # (B,S,Dc)
    q = h @ params["wq"]                                     # (B,S,DH)
    scores = jnp.einsum("bsd,bcd->bsc", c, cache)            # (B,S,C)
    iota = jnp.arange(CACHE)[None, None, :]
    logits, vals = [], []
    s_work = scores
    for _ in range(TOPK):
        m = jnp.max(s_work, -1, keepdims=True)
        first = jnp.min(jnp.where(s_work >= m, iota, CACHE), -1, keepdims=True)
        oh = (iota == first).astype(jnp.float32)
        r = jnp.einsum("bsc,bcd->bsd", oh, cache)
        k_i = r @ params["wk"]
        v_i = r @ params["wv"]
        logits.append(jnp.sum(q * k_i, -1, keepdims=True))
        vals.append(v_i)
        s_work = jnp.where(oh > 0.0, -jnp.inf, s_work)
    logits = jnp.concatenate(logits, -1) / (DH ** 0.5)
    p = jax.nn.softmax(logits, -1)
    attn = sum(p[..., i:i + 1] * vals[i] for i in range(TOPK))
    out = h + attn @ params["wo"]
    new_cache = lax.dynamic_update_slice(cache, c, (0, off % CACHE, 0))
    return out, new_cache


if __name__ == "__main__":
    key = jax.random.PRNGKey(0)
    k_h, k_c, k1, k2, k3, k4, k5 = jax.random.split(key, 7)

    h = jax.random.normal(k_h, (B, S, H), jnp.float32)
    cache = jax.random.normal(k_c, (B, CACHE, DC), jnp.float32)
    start_of_sequence = jnp.array([False, True])
    write_offset = 16        # circular-buffer pointer (multiple of S)

    params = {
        "wc": 0.1 * jax.random.normal(k1, (H, DC), jnp.float32),
        "wq": 0.1 * jax.random.normal(k2, (H, DH), jnp.float32),
        "wk": 0.1 * jax.random.normal(k3, (DC, DH), jnp.float32),
        "wv": 0.1 * jax.random.normal(k4, (DC, DH), jnp.float32),
        "wo": 0.1 * jax.random.normal(k5, (DH, H), jnp.float32),
    }

    out, new_cache = jax.jit(neurocache_forward)(
        h, cache, params, start_of_sequence, jnp.int32(write_offset))
    jax.block_until_ready((out, new_cache))

    ref_out, ref_cache = _reference(h, cache, params, start_of_sequence,
                                    write_offset)
    # approx reciprocal in the softmax => slightly looser tolerance than 1e-4
    assert jnp.allclose(out, ref_out, atol=1e-3, rtol=1e-3), "out mismatch"
    assert jnp.allclose(new_cache, ref_cache, atol=1e-3, rtol=1e-3), \
        "cache mismatch"
    assert out.shape == (B, S, H) and new_cache.shape == (B, CACHE, DC)

    print("KERNEL_OK")
</pallas_src>

<mosaic_0001>
module attributes {stable_mosaic.version = 11 : i64} {
  func.func @_neurocache_kernel(%arg0: i32, %arg1: memref<1xi32, #tpu.memory_space<smem>>, %arg2: memref<1x8x32xf32, #tpu.memory_space<vmem>>, %arg3: memref<1x64x8xf32, #tpu.memory_space<vmem>>, %arg4: memref<32x16xf32, #tpu.memory_space<vmem>>, %arg5: memref<8x32xf32, #tpu.memory_space<vmem>>, %arg6: memref<1x8x32xf32, #tpu.memory_space<vmem>>, %arg7: memref<1x8x8xf32, #tpu.memory_space<vmem>>) attributes {dimension_semantics = [#tpu.dimension_semantics<parallel>], iteration_bounds = array<i64: 2>, scalar_prefetch = 1 : i64, scratch_operands = 0 : i64, tpu.core_type = #tpu.core_type<tc>, window_params = [{transform_indices = @transform_0, window_bounds = array<i64: 1, 8, 32>}, {transform_indices = @transform_1, window_bounds = array<i64: 1, 64, 8>}, {pipeline_mode = #tpu.pipeline_mode<synchronous>, transform_indices = @transform_2, window_bounds = array<i64: 32, 16>}, {pipeline_mode = #tpu.pipeline_mode<synchronous>, transform_indices = @transform_3, window_bounds = array<i64: 8, 32>}, {transform_indices = @transform_4, window_bounds = array<i64: 1, 8, 32>}, {transform_indices = @transform_5, window_bounds = array<i64: 1, 8, 8>}]} {
    %c0 = arith.constant 0 : index
    %c0_0 = arith.constant 0 : index
    %c0_1 = arith.constant 0 : index
    %0 = vector.load %arg2[%c0, %c0_0, %c0_1] : memref<1x8x32xf32, #tpu.memory_space<vmem>>, vector<1x8x32xf32>
    %1 = vector.shape_cast %0 : vector<1x8x32xf32> to vector<8x32xf32>
    %c0_2 = arith.constant 0 : index
    %c0_3 = arith.constant 0 : index
    %2 = vector.load %arg4[%c0_2, %c0_3] : memref<32x16xf32, #tpu.memory_space<vmem>>, vector<32x16xf32>
    %cst = arith.constant dense<0.000000e+00> : vector<8x16xf32>
    %3 = tpu.matmul %1, %2, %cst {dimension_numbers = #tpu.dot_dimension_numbers<[1], [0], [0], [1], [0, 0, 1, 1], [], []>, precision = #tpu.contract_precision<fp32>} : vector<8x32xf32>, vector<32x16xf32>, vector<8x16xf32> -> vector<8x16xf32>
    %4 = vector.extract_strided_slice %3 {offsets = [0, 0], sizes = [8, 8], strides = [1, 1]} : vector<8x16xf32> to vector<8x8xf32>
    %5 = vector.extract_strided_slice %3 {offsets = [0, 8], sizes = [8, 8], strides = [1, 1]} : vector<8x16xf32> to vector<8x8xf32>
    %c0_4 = arith.constant 0 : index
    %c0_5 = arith.constant 0 : index
    %c0_6 = arith.constant 0 : index
    %6 = vector.load %arg7[%c0_4, %c0_5, %c0_6] : memref<1x8x8xf32, #tpu.memory_space<vmem>>, vector<1x8x8xf32>
    %7 = vector.shape_cast %6 : vector<1x8x8xf32> to vector<8x8xf32>
    %8 = vector.shape_cast %4 : vector<8x8xf32> to vector<1x8x8xf32>
    tpu.vector_store %arg7[%c0_4, %c0_5, %c0_6], %8 {strides = array<i32>} : memref<1x8x8xf32, #tpu.memory_space<vmem>>, vector<1x8x8xf32>,
    %c0_7 = arith.constant 0 : index
    %c0_8 = arith.constant 0 : index
    %c0_9 = arith.constant 0 : index
    %9 = vector.load %arg3[%c0_7, %c0_8, %c0_9] : memref<1x64x8xf32, #tpu.memory_space<vmem>>, vector<1x64x8xf32>
    %10 = vector.shape_cast %9 : vector<1x64x8xf32> to vector<64x8xf32>
    %cst_10 = arith.constant dense<0.000000e+00> : vector<8x64xf32>
    %11 = tpu.matmul %4, %10, %cst_10 {dimension_numbers = #tpu.dot_dimension_numbers<[1], [1], [0], [0], [0, 0, 1, 0], [], []>, precision = #tpu.contract_precision<fp32>} : vector<8x8xf32>, vector<64x8xf32>, vector<8x64xf32> -> vector<8x64xf32>
    %cst_11 = arith.constant dense<0.000000e+00> : vector<8x64xf32>
    %12 = tpu.matmul %5, %10, %cst_11 {dimension_numbers = #tpu.dot_dimension_numbers<[1], [1], [0], [0], [0, 0, 1, 0], [], []>, precision = #tpu.contract_precision<fp32>} : vector<8x8xf32>, vector<64x8xf32>, vector<8x64xf32> -> vector<8x64xf32>
    %13 = tpu.iota {dimensions = array<i32: 1>} : vector<8x64xi32>
    %cst_12 = arith.constant dense<0xFF800000> : vector<8xf32>
    %14 = vector.multi_reduction <maximumf>, %11, %cst_12 [1] : vector<8x64xf32> to vector<8xf32>
    %15 = vector.shape_cast %14 : vector<8xf32> to vector<8x1xf32>
    %16 = vector.broadcast %15 : vector<8x1xf32> to vector<8x64xf32>
    %17 = arith.cmpf oge, %11, %16 : vector<8x64xf32>
    %c64_i32 = arith.constant 64 : i32
    %18 = vector.broadcast %c64_i32 : i32 to vector<8x64xi32>
    %19 = arith.select %17, %13, %18 : vector<8x64xi1>, vector<8x64xi32>
    %cst_13 = arith.constant dense<2147483647> : vector<8xi32>
    %20 = vector.multi_reduction <minsi>, %19, %cst_13 [1] : vector<8x64xi32> to vector<8xi32>
    %21 = vector.shape_cast %20 : vector<8xi32> to vector<8x1xi32>
    %22 = vector.broadcast %21 : vector<8x1xi32> to vector<8x64xi32>
    %23 = arith.cmpi eq, %13, %22 : vector<8x64xi32>
    %24 = arith.extui %23 : vector<8x64xi1> to vector<8x64xi32>
    %25 = arith.sitofp %24 : vector<8x64xi32> to vector<8x64xf32>
    %cst_14 = arith.constant 0.000000e+00 : f32
    %26 = vector.broadcast %cst_14 : f32 to vector<8x64xf32>
    %27 = arith.cmpf ogt, %25, %26 : vector<8x64xf32>
    %cst_15 = arith.constant 0xFF800000 : f32
    %28 = vector.broadcast %cst_15 : f32 to vector<8x64xf32>
    %29 = arith.select %27, %28, %11 : vector<8x64xi1>, vector<8x64xf32>
    %cst_16 = arith.constant dense<0xFF800000> : vector<8xf32>
    %30 = vector.multi_reduction <maximumf>, %29, %cst_16 [1] : vector<8x64xf32> to vector<8xf32>
    %31 = vector.shape_cast %30 : vector<8xf32> to vector<8x1xf32>
    %32 = vector.broadcast %31 : vector<8x1xf32> to vector<8x64xf32>
    %33 = arith.cmpf oge, %29, %32 : vector<8x64xf32>
    %c64_i32_17 = arith.constant 64 : i32
    %34 = vector.broadcast %c64_i32_17 : i32 to vector<8x64xi32>
    %35 = arith.select %33, %13, %34 : vector<8x64xi1>, vector<8x64xi32>
    %cst_18 = arith.constant dense<2147483647> : vector<8xi32>
    %36 = vector.multi_reduction <minsi>, %35, %cst_18 [1] : vector<8x64xi32> to vector<8xi32>
    %37 = vector.shape_cast %36 : vector<8xi32> to vector<8x1xi32>
    %38 = vector.broadcast %37 : vector<8x1xi32> to vector<8x64xi32>
    %39 = arith.cmpi eq, %13, %38 : vector<8x64xi32>
    %40 = arith.extui %39 : vector<8x64xi1> to vector<8x64xi32>
    %41 = arith.sitofp %40 : vector<8x64xi32> to vector<8x64xf32>
    %cst_19 = arith.constant 0.000000e+00 : f32
    %42 = vector.broadcast %cst_19 : f32 to vector<8x64xf32>
    %43 = arith.cmpf ogt, %41, %42 : vector<8x64xf32>
    %cst_20 = arith.constant 0xFF800000 : f32
    %44 = vector.broadcast %cst_20 : f32 to vector<8x64xf32>
    %45 = arith.select %43, %44, %29 : vector<8x64xi1>, vector<8x64xf32>
    %cst_21 = arith.constant dense<0xFF800000> : vector<8xf32>
    %46 = vector.multi_reduction <maximumf>, %45, %cst_21 [1] : vector<8x64xf32> to vector<8xf32>
    %47 = vector.shape_cast %46 : vector<8xf32> to vector<8x1xf32>
    %48 = vector.broadcast %47 : vector<8x1xf32> to vector<8x64xf32>
    %49 = arith.cmpf oge, %45, %48 : vector<8x64xf32>
    %c64_i32_22 = arith.constant 64 : i32
    %50 = vector.broadcast %c64_i32_22 : i32 to vector<8x64xi32>
    %51 = arith.select %49, %13, %50 : vector<8x64xi1>, vector<8x64xi32>
    %cst_23 = arith.constant dense<2147483647> : vector<8xi32>
    %52 = vector.multi_reduction <minsi>, %51, %cst_23 [1] : vector<8x64xi32> to vector<8xi32>
    %53 = vector.shape_cast %52 : vector<8xi32> to vector<8x1xi32>
    %54 = vector.broadcast %53 : vector<8x1xi32> to vector<8x64xi32>
    %55 = arith.cmpi eq, %13, %54 : vector<8x64xi32>
    %56 = arith.extui %55 : vector<8x64xi1> to vector<8x64xi32>
    %57 = arith.sitofp %56 : vector<8x64xi32> to vector<8x64xf32>
    %cst_24 = arith.constant 0.000000e+00 : f32
    %58 = vector.broadcast %cst_24 : f32 to vector<8x64xf32>
    %59 = arith.cmpf ogt, %57, %58 : vector<8x64xf32>
    %cst_25 = arith.constant 0xFF800000 : f32
    %60 = vector.broadcast %cst_25 : f32 to vector<8x64xf32>
    %61 = arith.select %59, %60, %45 : vector<8x64xi1>, vector<8x64xf32>
    %cst_26 = arith.constant dense<0xFF800000> : vector<8xf32>
    %62 = vector.multi_reduction <maximumf>, %61, %cst_26 [1] : vector<8x64xf32> to vector<8xf32>
    %63 = vector.shape_cast %62 : vector<8xf32> to vector<8x1xf32>
    %64 = vector.broadcast %63 : vector<8x1xf32> to vector<8x64xf32>
    %65 = arith.cmpf oge, %61, %64 : vector<8x64xf32>
    %c64_i32_27 = arith.constant 64 : i32
    %66 = vector.broadcast %c64_i32_27 : i32 to vector<8x64xi32>
    %67 = arith.select %65, %13, %66 : vector<8x64xi1>, vector<8x64xi32>
    %cst_28 = arith.constant dense<2147483647> : vector<8xi32>
    %68 = vector.multi_reduction <minsi>, %67, %cst_28 [1] : vector<8x64xi32> to vector<8xi32>
    %69 = vector.shape_cast %68 : vector<8xi32> to vector<8x1xi32>
    %70 = vector.broadcast %69 : vector<8x1xi32> to vector<8x64xi32>
    %71 = arith.cmpi eq, %13, %70 : vector<8x64xi32>
    %72 = arith.extui %71 : vector<8x64xi1> to vector<8x64xi32>
    %73 = arith.sitofp %72 : vector<8x64xi32> to vector<8x64xf32>
    %74 = arith.mulf %25, %12 : vector<8x64xf32>
    %cst_29 = arith.constant dense<0.000000e+00> : vector<8xf32>
    %75 = vector.multi_reduction <add>, %74, %cst_29 [1] : vector<8x64xf32> to vector<8xf32>
    %76 = vector.shape_cast %75 : vector<8xf32> to vector<8x1xf32>
    %cst_30 = arith.constant 2.500000e-01 : f32
    %77 = vector.broadcast %cst_30 : f32 to vector<8x1xf32>
    %78 = arith.mulf %76, %77 : vector<8x1xf32>
    %79 = arith.mulf %41, %12 : vector<8x64xf32>
    %cst_31 = arith.constant dense<0.000000e+00> : vector<8xf32>
    %80 = vector.multi_reduction <add>, %79, %cst_31 [1] : vector<8x64xf32> to vector<8xf32>
    %81 = vector.shape_cast %80 : vector<8xf32> to vector<8x1xf32>
    %cst_32 = arith.constant 2.500000e-01 : f32
    %82 = vector.broadcast %cst_32 : f32 to vector<8x1xf32>
    %83 = arith.mulf %81, %82 : vector<8x1xf32>
    %84 = arith.mulf %57, %12 : vector<8x64xf32>
    %cst_33 = arith.constant dense<0.000000e+00> : vector<8xf32>
    %85 = vector.multi_reduction <add>, %84, %cst_33 [1] : vector<8x64xf32> to vector<8xf32>
    %86 = vector.shape_cast %85 : vector<8xf32> to vector<8x1xf32>
    %cst_34 = arith.constant 2.500000e-01 : f32
    %87 = vector.broadcast %cst_34 : f32 to vector<8x1xf32>
    %88 = arith.mulf %86, %87 : vector<8x1xf32>
    %89 = arith.mulf %73, %12 : vector<8x64xf32>
    %cst_35 = arith.constant dense<0.000000e+00> : vector<8xf32>
    %90 = vector.multi_reduction <add>, %89, %cst_35 [1] : vector<8x64xf32> to vector<8xf32>
    %91 = vector.shape_cast %90 : vector<8xf32> to vector<8x1xf32>
    %cst_36 = arith.constant 2.500000e-01 : f32
    %92 = vector.broadcast %cst_36 : f32 to vector<8x1xf32>
    %93 = arith.mulf %91, %92 : vector<8x1xf32>
    %94 = arith.maximumf %78, %83 : vector<8x1xf32>
    %95 = arith.maximumf %94, %88 : vector<8x1xf32>
    %96 = arith.maximumf %95, %93 : vector<8x1xf32>
    %97 = arith.subf %78, %96 : vector<8x1xf32>
    %98 = math.exp %97 : vector<8x1xf32>
    %99 = arith.subf %83, %96 : vector<8x1xf32>
    %100 = math.exp %99 : vector<8x1xf32>
    %101 = arith.subf %88, %96 : vector<8x1xf32>
    %102 = math.exp %101 : vector<8x1xf32>
    %103 = arith.subf %93, %96 : vector<8x1xf32>
    %104 = math.exp %103 : vector<8x1xf32>
    %105 = arith.addf %98, %100 : vector<8x1xf32>
    %106 = arith.addf %105, %102 : vector<8x1xf32>
    %107 = arith.addf %106, %104 : vector<8x1xf32>
    %108 = tpu.reciprocal %107 {approx = true} : vector<8x1xf32> -> vector<8x1xf32>
    %109 = arith.mulf %98, %108 : vector<8x1xf32>
    %110 = vector.broadcast %109 : vector<8x1xf32> to vector<8x64xf32>
    %111 = arith.mulf %110, %25 : vector<8x64xf32>
    %112 = arith.mulf %100, %108 : vector<8x1xf32>
    %113 = vector.broadcast %112 : vector<8x1xf32> to vector<8x64xf32>
    %114 = arith.mulf %113, %41 : vector<8x64xf32>
    %115 = arith.addf %111, %114 : vector<8x64xf32>
    %116 = arith.mulf %102, %108 : vector<8x1xf32>
    %117 = vector.broadcast %116 : vector<8x1xf32> to vector<8x64xf32>
    %118 = arith.mulf %117, %57 : vector<8x64xf32>
    %119 = arith.addf %115, %118 : vector<8x64xf32>
    %120 = arith.mulf %104, %108 : vector<8x1xf32>
    %121 = vector.broadcast %120 : vector<8x1xf32> to vector<8x64xf32>
    %122 = arith.mulf %121, %73 : vector<8x64xf32>
    %123 = arith.addf %119, %122 : vector<8x64xf32>
    %cst_37 = arith.constant dense<0.000000e+00> : vector<8x8xf32>
    %124 = tpu.matmul %123, %10, %cst_37 {dimension_numbers = #tpu.dot_dimension_numbers<[1], [0], [0], [1], [0, 0, 1, 1], [], []>, precision = #tpu.contract_precision<fp32>} : vector<8x64xf32>, vector<64x8xf32>, vector<8x8xf32> -> vector<8x8xf32>
    %c0_38 = arith.constant 0 : index
    %c0_39 = arith.constant 0 : index
    %c0_40 = arith.constant 0 : index
    %125 = vector.load %arg2[%c0_38, %c0_39, %c0_40] : memref<1x8x32xf32, #tpu.memory_space<vmem>>, vector<1x8x32xf32>
    %126 = vector.shape_cast %125 : vector<1x8x32xf32> to vector<8x32xf32>
    %c0_41 = arith.constant 0 : index
    %c0_42 = arith.constant 0 : index
    %127 = vector.load %arg5[%c0_41, %c0_42] : memref<8x32xf32, #tpu.memory_space<vmem>>, vector<8x32xf32>
    %cst_43 = arith.constant dense<0.000000e+00> : vector<8x32xf32>
    %128 = tpu.matmul %124, %127, %cst_43 {dimension_numbers = #tpu.dot_dimension_numbers<[1], [0], [0], [1], [0, 0, 1, 1], [], []>, precision = #tpu.contract_precision<fp32>} : vector<8x8xf32>, vector<8x32xf32>, vector<8x32xf32> -> vector<8x32xf32>
    %129 = arith.addf %126, %128 : vector<8x32xf32>
    %c0_44 = arith.constant 0 : index
    %c0_45 = arith.constant 0 : index
    %c0_46 = arith.constant 0 : index
    %130 = vector.load %arg6[%c0_44, %c0_45, %c0_46] : memref<1x8x32xf32, #tpu.memory_space<vmem>>, vector<1x8x32xf32>
    %131 = vector.shape_cast %130 : vector<1x8x32xf32> to vector<8x32xf32>
    %132 = vector.shape_cast %129 : vector<8x32xf32> to vector<1x8x32xf32>
    tpu.vector_store %arg6[%c0_44, %c0_45, %c0_46], %132 {strides = array<i32>} : memref<1x8x32xf32, #tpu.memory_space<vmem>>, vector<1x8x32xf32>,
    return
  }
  func.func @transform_0(%arg0: i32, %arg1: memref<1xi32, #tpu.memory_space<smem>>) -> (i32, i32, i32) {
    %c0_i32 = arith.constant 0 : i32
    %c0_i32_0 = arith.constant 0 : i32
    %c0_i32_1 = arith.constant 0 : i32
    return %arg0, %c0_i32, %c0_i32_0 : i32, i32, i32
  }
  func.func @transform_1(%arg0: i32, %arg1: memref<1xi32, #tpu.memory_space<smem>>) -> (i32, i32, i32) {
    %c0_i32 = arith.constant 0 : i32
    %c0_i32_0 = arith.constant 0 : i32
    %c0_i32_1 = arith.constant 0 : i32
    return %arg0, %c0_i32, %c0_i32_0 : i32, i32, i32
  }
  func.func @transform_2(%arg0: i32, %arg1: memref<1xi32, #tpu.memory_space<smem>>) -> (i32, i32) {
    %c0_i32 = arith.constant 0 : i32
    %c0_i32_0 = arith.constant 0 : i32
    %c0_i32_1 = arith.constant 0 : i32
    return %c0_i32, %c0_i32_0 : i32, i32
  }
  func.func @transform_3(%arg0: i32, %arg1: memref<1xi32, #tpu.memory_space<smem>>) -> (i32, i32) {
    %c0_i32 = arith.constant 0 : i32
    %c0_i32_0 = arith.constant 0 : i32
    %c0_i32_1 = arith.constant 0 : i32
    return %c0_i32, %c0_i32_0 : i32, i32
  }
  func.func @transform_4(%arg0: i32, %arg1: memref<1xi32, #tpu.memory_space<smem>>) -> (i32, i32, i32) {
    %c0_i32 = arith.constant 0 : i32
    %c0_i32_0 = arith.constant 0 : i32
    %c0_i32_1 = arith.constant 0 : i32
    return %arg0, %c0_i32, %c0_i32_0 : i32, i32, i32
  }
  func.func @transform_5(%arg0: i32, %arg1: memref<1xi32, #tpu.memory_space<smem>>) -> (i32, i32, i32) {
    %c0 = arith.constant 0 : index
    %0 = memref.load %arg1[%c0] : memref<1xi32, #tpu.memory_space<smem>>
    %c0_i32 = arith.constant 0 : i32
    %c0_i32_0 = arith.constant 0 : i32
    return %arg0, %0, %c0_i32 : i32, i32, i32
  }
}

</mosaic_0001>

<bundles_post_ra>
// kernel: neurocache_forward.1
= control target key start
LH: loop header
LB: loop body
LE: loop exit
PB: predicated region body
PF: predicated region fallthrough
CT: control target
= control target key end

     0   :  { %s4932_s0 = inlined_call_operand.<no memory space> [shape: s32[1], index: 0, kind: input, shape index: {}]   ;;  %s4933_s1 = inlined_call_operand.vmem [shape: f32[2,8,32], index: 1, kind: input, shape index: {}]   ;;  %s4934_s2 = inlined_call_operand.vmem [shape: f32[2,64,8], index: 2, kind: input, shape index: {}, may-alias: {2,6}]   ;;  %s4935_s3 = inlined_call_operand.vmem [shape: f32[32,16], index: 3, kind: input, shape index: {}]   ;;  %s4936_s4 = inlined_call_operand.vmem [shape: f32[8,32], index: 4, kind: input, shape index: {}]   ;;  %s4937_s5 = inlined_call_operand.hbm [shape: f32[2,8,32], index: 5, kind: output, shape index: {0}]   ;;  %s4938_s6 = inlined_call_operand.vmem [shape: f32[2,64,8], index: 6, kind: output, shape index: {1}, may-alias: {2,6}]  }
   0x1   :  { %12 = sst [smem:[#allocation3]] %s4932_s0 }
   0x2   :  { %13 = vsyncpa [#allocation5], 0 }
   0x3   :  { %15 = vsyncpa [#allocation5 + $0x1], 0  ;;  %s4268_s23 = smov 0   ;;  %s4270_s24 = smov 0  }
   0x4   :  { %s4272_s25 = smov 0   ;;  %s4274_s26 = smov 0  }
   0x5 LB: > { %s4289_s0 = sadd.s32 4294967295, %s4223_s26   ;;  %s3156_s27 = sadd.s32 4294967294, %s4223_s26   ;;  %s4223_s26 = sphi %s4274_s26, %s4973_s26   ;;  %s4219_s25 = sphi %s4272_s25, %s4972_s25   ;;  %s4215_s24 = sphi %s4270_s24, %s4971_s24   ;;  %s4211_s23 = sphi %s4268_s23, %s4970_s23  }
   0x6   : > { %s4293_s28 = sadd.s32 1, %s4223_s26   ;;  %s122_s29 = sadd.s32 1, %s4219_s25 }
   0x7   : > { %s119_s30 = ssub.s32 %s4223_s26, %s4293_s28  ;;  %p132_p0 = scmp.ne.s32.totalorder %s4219_s25, %s4215_s24 }
   0x8   : > { %p120_p1 = scmp.eq.s32.totalorder %s119_s30, 0  ;;  %p133_p2 = scmp.eq.s32.totalorder %s4289_s0, 1 }
   0x9   : > { %p138_p3 = scmp.ne.s32.totalorder %s4215_s24, %s4211_s23  ;;  %p139_p4 = scmp.eq.s32.totalorder %s3156_s27, 1 }
   0xa   : > { %s4304_s7 = scalar_select %p120_p1, %s4219_s25, %s122_s29  }
   0xb   : > { %p4306_p5 = por %p133_p2, %p132_p0  ;;  %p4310_p6 = por %p139_p4, %p138_p3 }
   0xc   : > { %p3159_p7 = scmp.ge.s32.totalorder %s4223_s26, 1  ;;  %p208_p8 = scmp.lt.s32.totalorder %s4223_s26, 3 }
   0xe   : > { %p209_p9 = pnand %p3159_p7, %p208_p8 }
  0x10   : > { %212 = sbr.rel (%p209_p9) target bundleno = 3206 (0xc86), region = 36 }
  0x17   : > { %v269_v0 = vld [vmem:[%s4935_s3] sm:$0xff]  ;;  %v270_v1 = vld [vmem:[%s4935_s3 + $0x8] sm:$0xff]  ;;  %v271_v2 = vld [vmem:[%s4935_s3 + $0x10] sm:$0xff]  ;;  %v4948_v3 = vmov 0.0|0.0   ;;  %vm4226_vm0 = vmmov 0   ;;  %v4944_v8 = vmov 0.0  }
  0x18   : > { %3817 = vmatprep.subr.bf16.mxu0 %v4948_v3  ;;  %v278_v4 = vand.u32 4294901760, %v269_v0  ;;  %v281_v5 = vand.u32 4294901760, %v270_v1  ;;  %v272_v6 = vld [vmem:[%s4935_s3 + $0x18] sm:$0xff]  ;;  %v284_v7 = vand.u32 4294901760, %v271_v2  ;;  %3387 = vmatprep.mubr.msk.f32.mxu0 %vm4226_vm0, %v4944_v8  ;;  %p249_p10 = scmp.lt.s32.totalorder %s4289_s0, 1  ;;  %vm273_vm1 = vcmask 261120  }
  0x19   : > { %v287_v9 = vand.u32 4294901760, %v272_v6  ;;  %3853 = vmatprep.subr.bf16.mxu1 %v4948_v3  ;;  %3461 = vmatprep.mubr.msk.f32.mxu1 %vm4226_vm0, %v4944_v8  ;;  %s258_s27 = sld [smem:[#allocation3]]  ;;  %vm762_vm2 = vcmask 64512   ;;  %vm1879_vm3 = vcmask 523264   ;;  %s4228_s17 = smov 120  }
  0x1a   : > { %v4335_v10 = vpack.c.bf16 %v281_v5, %v278_v4  ;;  %v358_v11 = vsub.f32 %v269_v0, %v278_v4  ;;  %v365_v12 = vsub.f32 %v270_v1, %v281_v5  ;;  %v372_v13 = vsub.f32 %v271_v2, %v284_v7  ;;  %s4338_s18 = scalar_select %p249_p10, %s4289_s0, 1 }
  0x1b   : > { %v379_v14 = vsub.f32 %v272_v6, %v287_v9  ;;  %v3821_v15 = vpack.c.bf16 %v287_v9, %v284_v7  ;;  %s235_s20 = sand.u32 1, %s4215_s24  }
  0x1c   : > { %3819 = vmatpush3.bf16.msra.mxu0 %v4335_v10  ;;  %s3161_s19 = sshll.u32 %s4338_s18, 3  ;;  %v359_v16 = vand.u32 4294901760, %v358_v11  ;;  %v366_v17 = vand.u32 4294901760, %v365_v12  ;;  %v373_v19 = vand.u32 4294901760, %v372_v13  ;;  %v3830_v37 = vpack.c.bf16 %v365_v12, %v358_v11  ;;  %s3174_s13 = sshll.u32 %s4338_s18, 6 }
  0x1d   : > { %3820 = vmatprep.subr.bf16.mxu0 %v4948_v3  ;;  %s4348_s22 = scalar_lea.vmem %s4933_s1, %s3161_s19  ;;  %v380_v23 = vand.u32 4294901760, %v379_v14  ;;  %v3833_v38 = vpack.c.bf16 %v379_v14, %v372_v13  ;;  %s257_s16 = scalar_lea.vmem %s4934_s2, %s3174_s13 }
  0x1e   : > { %v268_v18 = vld [vmem:[%s4348_s22] sm:$0xff]  ;;  %v360_v21 = vsub.f32 %v358_v11, %v359_v16  ;;  %v367_v22 = vsub.f32 %v365_v12, %v366_v17  ;;  %v374_v28 = vsub.f32 %v372_v13, %v373_v19  ;;  %v3842_v39 = vpack.c.bf16 %v366_v17, %v359_v16  ;;  %s3160_s21 = sshll.u32 %s235_s20, 3 }
  0x1f   : > { %v275_v20 = vsel %vm273_vm1, %v268_v18, 0  ;;  %v381_v29 = vsub.f32 %v379_v14, %v380_v23  ;;  %v3845_v40 = vpack.c.bf16 %v380_v23, %v373_v19  ;;  %p261_p11 = scmp.lt.s32.totalorder %s258_s27, 7 }
  0x20   : > { %3822 = vmatpush3.bf16.msra.mxu0 %v3821_v15  ;;  %v346_v24 = vand.u32 4294901760, %v275_v20  ;;  %v361_v26 = vand.u32 4294901760, %v360_v21  ;;  %v368_v27 = vand.u32 4294901760, %v367_v22  ;;  %v375_v33 = vand.u32 4294901760, %v374_v28 }
  0x21   : > { %3823 = vmatprep.subr.bf16.mxu0 %v4948_v3  ;;  %v382_v34 = vand.u32 4294901760, %v381_v29  ;;  %s4975_s27 = smov (!%p261_p11, %s258_s27), 7 }
  0x22   : > { %v347_v25 = vsub.f32 %v275_v20, %v346_v24  ;;  %v3824_v32 = vpack.c.bf16 %v368_v27, %v361_v26  ;;  %s264_s29 = sadd.s32 %s3161_s19, %s4975_s27  ;;  %s3171_s27 = sshll.u32 %s4289_s0, 7 }
  0x23   : > { %v3827_v36 = vpack.c.bf16 %v382_v34, %v375_v33  ;;  %s3165_s30 = sshll.u32 %s264_s29, 3  ;;  %s237_s29 = scalar_lea.vmem [#allocation4], %s3160_s21 }
  0x24   : > { %v348_v30 = vand.u32 4294901760, %v347_v25  ;;  %s266_s12 = scalar_lea.vmem %s4938_s6, %s3165_s30  ;;  %s3044_s30 = sshll.u32 %s237_s29, 4  ;;  %s4891_s30 = int_to_ptr.vmem [resolvable:$true] %s3044_s30 }
  0x25   : > { %s4161_s13 = scalar_lea.vmem %s4891_s30, 128  ;;  %s4229_s0 = smov [#allocation4]  }
  0x26   : > { %v349_v31 = vsub.f32 %v347_v25, %v348_v30  ;;  %p4162_p12 = scmp.ne.s32.totalorder %s4891_s30, %s4161_s13  ;;  %s4165_s14 = sshll.u32 %s4229_s0, 4  ;;  %s4166_s14 = int_to_ptr.vmem [resolvable:$false] %s4165_s14 }
  0x27   : > { %s4167_s15 = scalar_lea.vmem %s4166_s14, 256  ;;  %p4168_p1 = scmp.lt.s32.totalorder %s4891_s30, %s4166_s14 }
  0x28   : > { %v350_v35 = vand.u32 4294901760, %v349_v31  ;;  %p4163_p13 = pnand %p4162_p12, %p4306_p5  ;;  %p4169_p2 = scmp.lt.s32.totalorder %s4167_s15, %s4161_s13 }
  0x2a   : > { %3388 = vmatmul.mubr.f32.vlgmr.msra.gmra.mrb[0].mxu0 %v350_v35  ;;  %p4164_p0 = pneg %p4163_p13  ;;  %p4170_p3 = por %p4169_p2, %p4168_p1 }
  0x2b   : > { %3825 = vmatpush3.bf16.msra.mxu0 %v3824_v32  ;;  %3398 = vmatprep.mubr.msk.f32.mxu0 %vm4226_vm0, %v4944_v8 }
  0x2c   : > { %3826 = vmatprep.subr.bf16.mxu0 %v4948_v3  ;;  %p4171_p4 = pnand %p4170_p3, %p4164_p0 }
  0x2f   : > { %3828 = vmatpush3.bf16.msra.mxu0 %v3827_v36 }
  0x30   : > { %3829 = vmatprep.subr.bf16.mxu0 %v4948_v3 }
  0x32   : > { %3399 = vmatmul.mubr.f32.vlgmr.msra.gmra.mrb[0].mxu0 %v346_v24 }
  0x33   : > { %3831 = vmatpush3.bf16.msra.mxu0 %v3830_v37  ;;  %3409 = vmatprep.mubr.msk.f32.mxu0 %vm4226_vm0, %v4944_v8 }
  0x34   : > { %3832 = vmatprep.subr.bf16.mxu0 %v4948_v3 }
  0x37   : > { %3834 = vmatpush3.bf16.msra.mxu0 %v3833_v38 }
  0x38   : > { %3835 = vmatprep.subr.bf16.mxu0 %v4948_v3 }
  0x3a   : > { %3410 = vmatmul.mubr.f32.vlgmr.msra.gmra.mrb[0].mxu0 %v347_v25 }
  0x3b   : > { %3837 = vmatpush3.bf16.msra.mxu0 %v4335_v10  ;;  %3420 = vmatprep.mubr.msk.f32.mxu0 %vm4226_vm0, %v4944_v8 }
  0x3c   : > { %3838 = vmatprep.subr.bf16.mxu0 %v4948_v3 }
  0x3f   : > { %3840 = vmatpush3.bf16.msra.mxu0 %v3821_v15 }
  0x40   : > { %3841 = vmatprep.subr.bf16.mxu0 %v4948_v3 }
  0x42   : > { %3421 = vmatmul.mubr.f32.vlgmr.msra.gmra.mrb[0].mxu0 %v348_v30 }
  0x43   : > { %3843 = vmatpush3.bf16.msra.mxu0 %v3842_v39  ;;  %3431 = vmatprep.mubr.msk.f32.mxu0 %vm4226_vm0, %v4944_v8 }
  0x44   : > { %3844 = vmatprep.subr.bf16.mxu0 %v4948_v3 }
  0x47   : > { %3846 = vmatpush3.bf16.msra.mxu0 %v3845_v40 }
  0x48   : > { %3847 = vmatprep.subr.bf16.mxu0 %v4948_v3 }
  0x4a   : > { %3432 = vmatmul.mubr.f32.vlgmr.msra.gmra.mrb[0].mxu0 %v346_v24 }
  0x4b   : > { %3849 = vmatpush3.bf16.msra.mxu0 %v4335_v10  ;;  %3442 = vmatprep.mubr.msk.f32.mxu0 %vm4226_vm0, %v4944_v8 }
  0x4c   : > { %3850 = vmatprep.subr.bf16.mxu0 %v4948_v3 }
  0x4f   : > { %3852 = vmatpush3.bf16.msra.mxu0 %v3821_v15 }
  0x50   : > { %3925 = vmatprep.subr.bf16.mxu0 %v4948_v3 }
  0x52   : > { %3443 = vmatmul.mubr.f32.vlgmr.msra.gmra.mrb[0].mxu0 %v346_v24 }
  0x53   : > { %3575 = vmatprep.mubr.msk.f32.mxu0 %vm4226_vm0, %v4944_v8 }
 0x125   : > { %v4382_v41 = vpop.f32.mrb[0].mxu0 }
 0x126   : > { %4955 = vst [vmem:[#allocation7_spill] sm:$0xff] %v4382_v41  ;;  %763 = vst.msk [vmem:[%s266_s12] sm:$0xff] %vm762_vm2, %v4382_v41  ;;  %v3444_v42 = vpop.f32.mrb[1].mxu0  ;;  %v773_v43 = vsel %vm762_vm2, %v4382_v41, 0  ;;  %s4889_s12 = scalar_lea.hbm %s4937_s5, %s3171_s27 }
 0x127   : > { %v4416_v58 = vand.u32 4294901760, %v773_v43 }
 0x129   : > { %v4431_v7 = vsub.f32 %v773_v43, %v4416_v58 }
 0x12b   : > { %v4939_v18 = vand.u32 4294901760, %v4431_v7 }
 0x12d   : > { %v4392_v44 = vld [vmem:[%s257_s16] sm:$0xff]  ;;  %v4394_v45 = vld [vmem:[%s257_s16 + $0x8] sm:$0xff]  ;;  %v4396_v46 = vld [vmem:[%s257_s16 + $0x10] sm:$0xff]  ;;  %v4471_v29 = vsub.f32 %v4431_v7, %v4939_v18 }
 0x12e   : > { %v776_v47 = vsel %vm762_vm2, %v4392_v44, 0  ;;  %v779_v48 = vsel %vm762_vm2, %v4394_v45, 0  ;;  %v4402_v49 = vld [vmem:[%s257_s16 + $0x18] sm:$0xff]  ;;  %v782_v50 = vsel %vm762_vm2, %v4396_v46, 0  ;;  %v4406_v51 = vld [vmem:[%s257_s16 + $0x20] sm:$0xff]  ;;  %v4408_v52 = vld [vmem:[%s257_s16 + $0x28] sm:$0xff] }
 0x12f   : > { %v800_v53 = vand.u32 4294901760, %v776_v47  ;;  %v803_v54 = vand.u32 4294901760, %v779_v48  ;;  %v785_v55 = vsel %vm762_vm2, %v4402_v49, 0  ;;  %v4412_v56 = vld [vmem:[%s257_s16 + $0x30] sm:$0xff]  ;;  %v4414_v57 = vld [vmem:[%s257_s16 + $0x38] sm:$0xff]  ;;  %v788_v59 = vsel %vm762_vm2, %v4406_v51, 0 }
 0x130   : > { %v791_v60 = vsel %vm762_vm2, %v4408_v52, 0  ;;  %v794_v61 = vsel %vm762_vm2, %v4412_v56, 0  ;;  %v806_v63 = vand.u32 4294901760, %v782_v50  ;;  %v809_v0 = vand.u32 4294901760, %v785_v55 }
 0x131   : > { %v4424_v62 = vpack.c.bf16 %v803_v54, %v800_v53  ;;  %v797_v1 = vsel %vm762_vm2, %v4414_v57, 0  ;;  %v812_v2 = vand.u32 4294901760, %v788_v59  ;;  %v815_v4 = vand.u32 4294901760, %v791_v60 }
 0x132   : > { %v818_v5 = vand.u32 4294901760, %v794_v61  ;;  %v821_v6 = vand.u32 4294901760, %v797_v1  ;;  %v4435_v9 = vsub.f32 %v776_v47, %v800_v53  ;;  %v4437_v10 = vsub.f32 %v779_v48, %v803_v54 }
 0x133   : > { %3855 = vmatpush3.bf16.xpose.msra.mxu1 %v4424_v62  ;;  %3927 = vmatpush3.bf16.xpose.msra.mxu0 %v4424_v62  ;;  %v4439_v11 = vsub.f32 %v782_v50, %v806_v63  ;;  %v4441_v12 = vsub.f32 %v785_v55, %v809_v0  ;;  %v4443_v13 = vsub.f32 %v788_v59, %v812_v2  ;;  %v2032_v27 = vand.u32 4294901760, %v4392_v44 }
 0x134   : > { %3856 = vmatprep.subr.bf16.mxu1 %v4948_v3  ;;  %3928 = vmatprep.subr.bf16.mxu0 %v4948_v3  ;;  %v4445_v14 = vsub.f32 %v791_v60, %v815_v4  ;;  %v4447_v15 = vsub.f32 %v794_v61, %v818_v5  ;;  %v4449_v16 = vsub.f32 %v797_v1, %v821_v6  ;;  %v885_v19 = vand.u32 4294901760, %v4435_v9 }
 0x135   : > { %v4451_v17 = vpack.c.bf16 %v809_v0, %v806_v63  ;;  %v892_v20 = vand.u32 4294901760, %v4437_v10  ;;  %v4947_v21 = vand.u32 4294901760, %v4439_v11  ;;  %v4946_v22 = vand.u32 4294901760, %v4441_v12 }
 0x136   : > { %v4943_v23 = vand.u32 4294901760, %v4443_v13  ;;  %v4942_v24 = vand.u32 4294901760, %v4445_v14  ;;  %v4941_v25 = vand.u32 4294901760, %v4447_v15  ;;  %v4940_v26 = vand.u32 4294901760, %v4449_v16 }
 0x137   : > { %v2035_v28 = vand.u32 4294901760, %v4394_v45  ;;  %v4473_v30 = vpack.c.bf16 %v815_v4, %v812_v2  ;;  %v4475_v31 = vpack.c.bf16 %v821_v6, %v818_v5  ;;  %v4478_v32 = vsub.f32 %v4435_v9, %v885_v19 }
 0x138   : > { %v4480_v33 = vpack.c.bf16 %v892_v20, %v885_v19  ;;  %v4483_v34 = vsub.f32 %v4437_v10, %v892_v20  ;;  %v4489_v35 = vpack.c.bf16 %v4946_v22, %v4947_v21  ;;  %v4495_v36 = vpack.c.bf16 %v4942_v24, %v4943_v23 }
 0x139   : > { %v4501_v37 = vpack.c.bf16 %v4940_v26, %v4941_v25  ;;  %v4504_v38 = vsub.f32 %v4392_v44, %v2032_v27  ;;  %v4507_v39 = vsub.f32 %v4394_v45, %v2035_v28  ;;  %v2038_v40 = vand.u32 4294901760, %v4396_v46 }
 0x13a   : > { %4956 = vst [vmem:[#allocation8_spill] sm:$0xff] %v4495_v36  ;;  %v2041_v42 = vand.u32 4294901760, %v4402_v49  ;;  %v2044_v43 = vand.u32 4294901760, %v4406_v51  ;;  %v2047_v47 = vand.u32 4294901760, %v4408_v52  ;;  %v2050_v48 = vand.u32 4294901760, %v4412_v56 }
 0x13b   : > { %3858 = vmatpush3.bf16.xpose.msra.mxu1 %v4451_v17  ;;  %3930 = vmatpush3.bf16.xpose.msra.mxu0 %v4451_v17  ;;  %4957 = vst [vmem:[#allocation9_spill] sm:$0xff] %v4501_v37  ;;  %v2053_v50 = vand.u32 4294901760, %v4414_v57  ;;  %v2117_v53 = vand.u32 4294901760, %v4504_v38  ;;  %v2124_v44 = vand.u32 4294901760, %v4507_v39  ;;  %v4518_v54 = vsub.f32 %v4396_v46, %v2038_v40 }
 0x13c   : > { %3859 = vmatprep.subr.bf16.mxu1 %v4948_v3  ;;  %3931 = vmatprep.subr.bf16.mxu0 %v4948_v3  ;;  %v4521_v45 = vsub.f32 %v4402_v49, %v2041_v42  ;;  %v4524_v55 = vsub.f32 %v4406_v51, %v2044_v43  ;;  %v4527_v59 = vsub.f32 %v4408_v52, %v2047_v47 }
 0x13d   : > { %v4530_v60 = vsub.f32 %v4412_v56, %v2050_v48  ;;  %v4533_v61 = vsub.f32 %v4414_v57, %v2053_v50  ;;  %v2118_v46 = vsub.f32 %v4504_v38, %v2117_v53  ;;  %v2125_v49 = vsub.f32 %v4507_v39, %v2124_v44 }
 0x13e   : > { %v2131_v51 = vand.u32 4294901760, %v4518_v54  ;;  %v2138_v63 = vand.u32 4294901760, %v4521_v45  ;;  %v2145_v52 = vand.u32 4294901760, %v4524_v55  ;;  %v2152_v56 = vand.u32 4294901760, %v4527_v59 }
 0x13f   : > { %v2159_v57 = vand.u32 4294901760, %v4530_v60  ;;  %v2166_v0 = vand.u32 4294901760, %v4533_v61  ;;  %v2119_v1 = vand.u32 4294901760, %v2118_v46  ;;  %v2126_v2 = vand.u32 4294901760, %v2125_v49 }
 0x140   : > { %v2132_v4 = vsub.f32 %v4518_v54, %v2131_v51  ;;  %v2139_v5 = vsub.f32 %v4521_v45, %v2138_v63  ;;  %v2146_v6 = vsub.f32 %v4524_v55, %v2145_v52  ;;  %v2153_v19 = vsub.f32 %v4527_v59, %v2152_v56 }
 0x141   : > { %v2160_v20 = vsub.f32 %v4530_v60, %v2159_v57  ;;  %v2167_v18 = vsub.f32 %v4533_v61, %v2166_v0  ;;  %v4553_v26 = vpack.c.bf16 %v2126_v2, %v2119_v1  ;;  %v4555_v23 = vpack.c.bf16 %v2035_v28, %v2032_v27 }
 0x142   : > { %v2133_v25 = vand.u32 4294901760, %v2132_v4  ;;  %v2140_v24 = vand.u32 4294901760, %v2139_v5  ;;  %v2147_v46 = vand.u32 4294901760, %v2146_v6  ;;  %v2154_v49 = vand.u32 4294901760, %v2153_v19 }
 0x143   : > { %3861 = vmatpush3.bf16.xpose.msra.mxu1 %v4473_v30  ;;  %3933 = vmatpush3.bf16.xpose.msra.mxu0 %v4473_v30  ;;  %v2161_v8 = vand.u32 4294901760, %v2160_v20  ;;  %v2168_v22 = vand.u32 4294901760, %v2167_v18  ;;  %v4561_v41 = vpack.c.bf16 %v2047_v47, %v2044_v43  ;;  %v4563_v37 = vpack.c.bf16 %v2053_v50, %v2050_v48 }
 0x144   : > { %3862 = vmatprep.subr.bf16.mxu1 %v4948_v3  ;;  %3934 = vmatprep.subr.bf16.mxu0 %v4948_v3  ;;  %v4557_v21 = vpack.c.bf16 %v2140_v24, %v2133_v25  ;;  %v4559_v3 = vpack.c.bf16 %v2041_v42, %v2038_v40  ;;  %v4565_v36 = vpack.c.bf16 %v2154_v49, %v2147_v46  ;;  %v887_v43 = vand.u32 4294901760, %v4478_v32 }
 0x145   : > { %v4567_v1 = vpack.c.bf16 %v2168_v22, %v2161_v8  ;;  %v4022_v27 = vpack.c.bf16 %v4507_v39, %v4504_v38  ;;  %v4025_v28 = vpack.c.bf16 %v4521_v45, %v4518_v54  ;;  %v4028_v18 = vpack.c.bf16 %v4527_v59, %v4524_v55 }
 0x146   : > { %v4031_v24 = vpack.c.bf16 %v4533_v61, %v4530_v60  ;;  %v4579_v25 = vpack.c.bf16 %v2124_v44, %v2117_v53  ;;  %v4958_v8 = vmov 0.0|0.0   ;;  %v4583_v22 = vpack.c.bf16 %v2138_v63, %v2131_v51 }
 0x147   : > { %v4585_v40 = vpack.c.bf16 %v2152_v56, %v2145_v52  ;;  %v4587_v42 = vpack.c.bf16 %v2166_v0, %v2159_v57  ;;  %v894_v47 = vand.u32 4294901760, %v4483_v34  ;;  %v876_v48 = vand.u32 4294901760, %v4471_v29 }
 0x148   : > { %v4959_v53 = vand.u32 4294901760, %v4439_v11  ;;  %v4960_v2 = vand.u32 4294901760, %v4441_v12  ;;  %v4961_v63 = vmov 0.0   ;;  %v4962_v52 = vand.u32 4294901760, %v4443_v13 }
 0x149   : > { %v4592_v50 = vpack.c.bf16 %v894_v47, %v887_v43  ;;  %v4963_v57 = vand.u32 4294901760, %v4445_v14  ;;  %v4964_v19 = vand.u32 4294901760, %v4447_v15  ;;  %v4965_v46 = vand.u32 4294901760, %v4449_v16 }
 0x14a   : > { %v900_v44 = vsub.f32 %v4439_v11, %v4959_v53  ;;  %v907_v51 = vsub.f32 %v4441_v12, %v4960_v2  ;;  %v914_v56 = vsub.f32 %v4443_v13, %v4962_v52  ;;  %v4630_v53 = vpack.c.bf16 %v4437_v10, %v4435_v9 }
 0x14b   : > { %3864 = vmatpush3.bf16.xpose.msra.mxu1 %v4475_v31  ;;  %3936 = vmatpush3.bf16.xpose.msra.mxu0 %v4475_v31  ;;  %v921_v0 = vsub.f32 %v4445_v14, %v4963_v57  ;;  %v928_v20 = vsub.f32 %v4447_v15, %v4964_v19  ;;  %v935_v49 = vsub.f32 %v4449_v16, %v4965_v46 }
 0x14c   : > { %3865 = vmatprep.subr.bf16.mxu1 %v4958_v8  ;;  %3937 = vmatprep.subr.bf16.mxu0 %v4958_v8  ;;  %v901_v32 = vand.u32 4294901760, %v900_v44  ;;  %v908_v29 = vand.u32 4294901760, %v907_v51  ;;  %v915_v4 = vand.u32 4294901760, %v914_v56  ;;  %v4639_v44 = vpack.c.bf16 %v4441_v12, %v4439_v11  ;;  %v4967_v12 = vld [vmem:[#allocation8_spill] sm:$0xff] }
 0x14d   : > { %v922_v5 = vand.u32 4294901760, %v921_v0  ;;  %v929_v43 = vand.u32 4294901760, %v928_v20  ;;  %v936_v47 = vand.u32 4294901760, %v935_v49  ;;  %v4645_v9 = vpack.c.bf16 %v4445_v14, %v4443_v13  ;;  %v4968_v13 = vld [vmem:[#allocation9_spill] sm:$0xff] }
 0x14e   : > { %v4604_v34 = vpack.c.bf16 %v908_v29, %v901_v32  ;;  %v4651_v10 = vpack.c.bf16 %v4449_v16, %v4447_v15  ;;  %v4966_v11 = vand.u32 4294901760, %v4431_v7  ;;  %v1877_v15 = vlaneseq }
 0x14f   : > { %v4614_v6 = vpack.c.bf16 %v922_v5, %v915_v4 }
 0x150   : > { %v4701_v16 = vand.u32 127, %v1877_v15 }
 0x152   : > { %3462 = vmatmul.mubr.f32.vlgmr.msra.gmra.mrb[0].mxu1 %v876_v48  ;;  %v4624_v48 = vpack.c.bf16 %v936_v47, %v929_v43 }
 0x153   : > { %3867 = vmatpush3.bf16.xpose.msra.mxu1 %v4592_v50  ;;  %3480 = vmatprep.mubr.msk.f32.mxu1 %vm4226_vm0, %v4961_v63 }
 0x154   : > { %3868 = vmatprep.subr.bf16.mxu1 %v4958_v8 }
 0x15b   : > { %3870 = vmatpush3.bf16.xpose.msra.mxu1 %v4604_v34 }
 0x15c   : > { %3871 = vmatprep.subr.bf16.mxu1 %v4958_v8 }
 0x163   : > { %3873 = vmatpush3.bf16.xpose.msra.mxu1 %v4614_v6 }
 0x164   : > { %3874 = vmatprep.subr.bf16.mxu1 %v4958_v8 }
 0x16b   : > { %3876 = vmatpush3.bf16.xpose.msra.mxu1 %v4624_v48 }
 0x16c   : > { %3877 = vmatprep.subr.bf16.mxu1 %v4958_v8 }
 0x172   : > { %3481 = vmatmul.mubr.f32.vlgmr.msra.gmra.mrb[0].mxu1 %v4416_v58 }
 0x173   : > { %3879 = vmatpush3.bf16.xpose.msra.mxu1 %v4630_v53  ;;  %3499 = vmatprep.mubr.msk.f32.mxu1 %vm4226_vm0, %v4961_v63 }
 0x174   : > { %3880 = vmatprep.subr.bf16.mxu1 %v4958_v8 }
 0x17b   : > { %3882 = vmatpush3.bf16.xpose.msra.mxu1 %v4639_v44 }
 0x17c   : > { %3883 = vmatprep.subr.bf16.mxu1 %v4958_v8 }
 0x183   : > { %3885 = vmatpush3.bf16.xpose.msra.mxu1 %v4645_v9 }
 0x184   : > { %3886 = vmatprep.subr.bf16.mxu1 %v4958_v8 }
 0x18b   : > { %3888 = vmatpush3.bf16.xpose.msra.mxu1 %v4651_v10 }
 0x18c   : > { %3889 = vmatprep.subr.bf16.mxu1 %v4958_v8 }
 0x192   : > { %3500 = vmatmul.mubr.f32.vlgmr.msra.gmra.mrb[0].mxu1 %v4431_v7 }
 0x193   : > { %3891 = vmatpush3.bf16.xpose.msra.mxu1 %v4424_v62  ;;  %3518 = vmatprep.mubr.msk.f32.mxu1 %vm4226_vm0, %v4961_v63 }
 0x194   : > { %3892 = vmatprep.subr.bf16.mxu1 %v4958_v8 }
 0x19b   : > { %3894 = vmatpush3.bf16.xpose.msra.mxu1 %v4451_v17 }
 0x19c   : > { %3895 = vmatprep.subr.bf16.mxu1 %v4958_v8 }
 0x1a3   : > { %3897 = vmatpush3.bf16.xpose.msra.mxu1 %v4473_v30 }
 0x1a4   : > { %3898 = vmatprep.subr.bf16.mxu1 %v4958_v8 }
 0x1ab   : > { %3900 = vmatpush3.bf16.xpose.msra.mxu1 %v4475_v31 }
 0x1ac   : > { %3901 = vmatprep.subr.bf16.mxu1 %v4958_v8 }
 0x1b2   : > { %3519 = vmatmul.mubr.f32.vlgmr.msra.gmra.mrb[0].mxu1 %v4966_v11 }
 0x1b3   : > { %3903 = vmatpush3.bf16.xpose.msra.mxu1 %v4480_v33  ;;  %3537 = vmatprep.mubr.msk.f32.mxu1 %vm4226_vm0, %v4961_v63 }
 0x1b4   : > { %3904 = vmatprep.subr.bf16.mxu1 %v4958_v8 }
 0x1bb   : > { %3906 = vmatpush3.bf16.xpose.msra.mxu1 %v4489_v35 }
 0x1bc   : > { %3907 = vmatprep.subr.bf16.mxu1 %v4958_v8 }
 0x1c3   : > { %3909 = vmatpush3.bf16.xpose.msra.mxu1 %v4967_v12 }
 0x1c4   : > { %3910 = vmatprep.subr.bf16.mxu1 %v4958_v8 }
 0x1cb   : > { %3912 = vmatpush3.bf16.xpose.msra.mxu1 %v4968_v13 }
 0x1cc   : > { %3913 = vmatprep.subr.bf16.mxu1 %v4958_v8 }
 0x1d2   : > { %3538 = vmatmul.mubr.f32.vlgmr.msra.gmra.mrb[0].mxu1 %v4416_v58 }
 0x1d3   : > { %3915 = vmatpush3.bf16.xpose.msra.mxu1 %v4424_v62  ;;  %3556 = vmatprep.mubr.msk.f32.mxu1 %vm4226_vm0, %v4961_v63 }
 0x1d4   : > { %3916 = vmatprep.subr.bf16.mxu1 %v4958_v8 }
 0x1db   : > { %3918 = vmatpush3.bf16.xpose.msra.mxu1 %v4451_v17 }
 0x1dc   : > { %3919 = vmatprep.subr.bf16.mxu1 %v4958_v8 }
 0x1e3   : > { %3921 = vmatpush3.bf16.xpose.msra.mxu1 %v4473_v30 }
 0x1e4   : > { %3922 = vmatprep.subr.bf16.mxu1 %v4958_v8 }
 0x1eb   : > { %3924 = vmatpush3.bf16.xpose.msra.mxu1 %v4475_v31 }
 0x1ec   : > { %4009 = vmatprep.subr.bf16.mxu1 %v4958_v8 }
 0x1f2   : > { %3557 = vmatmul.mubr.f32.vlgmr.msra.gmra.mrb[0].mxu1 %v4416_v58 }
 0x1f3   : > { %4011 = vmatpush3.bf16.msra.mxu1 %v4553_v26  ;;  %3708 = vmatprep.mubr.msk.f32.mxu1 %vm4226_vm0, %v4961_v63 }
 0x1f4   : > { %4012 = vmatprep.subr.bf16.mxu1 %v4958_v8 }
 0x1f7   : > { %4014 = vmatpush3.bf16.msra.mxu1 %v4557_v21 }
 0x1f8   : > { %4015 = vmatprep.subr.bf16.mxu1 %v4958_v8 }
 0x1fb   : > { %4017 = vmatpush3.bf16.msra.mxu1 %v4565_v36 }
 0x1fc   : > { %4018 = vmatprep.subr.bf16.mxu1 %v4958_v8 }
 0x1ff   : > { %4020 = vmatpush3.bf16.msra.mxu1 %v4567_v1 }
 0x200   : > { %4021 = vmatprep.subr.bf16.mxu1 %v4958_v8 }
 0x2c5   : > { %v1332_v58 = vpop.f32.mrb[0].mxu1 }
 0x2c6   : > { %v3558_v7 = vpop.f32.mrb[1].mxu1  ;;  %v1880_v14 = vsel %vm1879_vm3, %v1332_v58, -inf }
 0x2c7   : > { %1881 = vmax.xlane.f32.xlu0 %v1880_v14 }
 0x354   : > { %v1882_v21 = vpop.xlane.xlu0 %1881 }
 0x355   : > { %vm1883_vm4 = vcmp.ge.f32.partialorder %v1332_v58, %v1882_v21 }
 0x356   : > { %v1884_v26 = vsel %vm1883_vm4, %v4701_v16, 64 }
 0x357   : > { %v1885_v36 = vsel %vm1879_vm3, %v1884_v26, 2147483647 }
 0x358   : > { %v1887_v2 = vshra.s32 %v1885_v36, 16  ;;  %v1886_v1 = vand.u32 65535, %v1885_v36 }
 0x35a   : > { %v1889_v51 = vcvt.s32.f32 %v1887_v2  ;;  %v1888_v29 = vcvt.s32.f32 %v1886_v1 }
 0x35c   : > { %1890 = vmin.xlane.f32.xlu0 %v1889_v51 }
 0x3e9   : > { %v1891_v32 = vpop.xlane.xlu0 %1890 }
 0x3ea   : > { %vm1892_vm5 = vcmp.eq.f32.partialorder %v1889_v51, %v1891_v32  ;;  %v1897_v56 = vcvt.f32.s32 %v1891_v32 }
 0x3eb   : > { %v1893_v52 = vsel %vm1892_vm5, %v1888_v29, inf }
 0x3ec   : > { %1894 = vmin.xlane.f32.xlu1 %v1893_v52  ;;  %v1898_v0 = vshll.u32 %v1897_v56, 16 }
 0x479   : > { %v1895_v57 = vpop.xlane.xlu1 %1894 }
 0x47a   : > { %v1896_v4 = vcvt.f32.s32 %v1895_v57 }
 0x47c   : > { %v1899_v5 = vadd.s32 %v1898_v0, %v1896_v4 }
 0x47e   : > { %vm1900_vm6 = vcmp.eq.s32.totalorder %v4701_v16, %v1899_v5 }
 0x47f   : > { %v4707_v19 = vsel %vm1900_vm6, 1.0, %v4961_v63 }
 0x480   : > { %vm1903_vm7 = vcmp.gt.f32.partialorder %v4707_v19, 0.0 }
 0x481   : > { %v1904_v20 = vsel %vm1903_vm7, -inf, %v1332_v58  ;;  %v4969_v58 = vld [vmem:[#allocation7_spill] sm:$0xff] }
 0x482   : > { %v1905_v46 = vsel %vm1879_vm3, %v1904_v20, -inf }
 0x483   : > { %1906 = vmax.xlane.f32.xlu1 %v1905_v46 }
 0x510   : > { %v1907_v49 = vpop.xlane.xlu1 %1906 }
 0x511   : > { %vm1908_vm8 = vcmp.ge.f32.partialorder %v1904_v20, %v1907_v49 }
 0x512   : > { %v1909_v43 = vsel %vm1908_vm8, %v4701_v16, 64 }
 0x513   : > { %v1910_v47 = vsel %vm1879_vm3, %v1909_v43, 2147483647 }
 0x514   : > { %v1912_v11 = vshra.s32 %v1910_v47, 16  ;;  %v1911_v14 = vand.u32 65535, %v1910_v47 }
 0x516   : > { %v1914_v7 = vcvt.s32.f32 %v1912_v11  ;;  %v1913_v21 = vcvt.s32.f32 %v1911_v14 }
 0x518   : > { %1915 = vmin.xlane.f32.xlu0 %v1914_v7 }
 0x5a5   : > { %v1916_v15 = vpop.xlane.xlu0 %1915 }
 0x5a6   : > { %vm1917_vm9 = vcmp.eq.f32.partialorder %v1914_v7, %v1916_v15  ;;  %v1922_v36 = vcvt.f32.s32 %v1916_v15 }
 0x5a7   : > { %v1918_v26 = vsel %vm1917_vm9, %v1913_v21, inf }
 0x5a8   : > { %1919 = vmin.xlane.f32.xlu1 %v1918_v26  ;;  %v1923_v51 = vshll.u32 %v1922_v36, 16 }
 0x5b9   : > { %1336 = vrot.lane.b32.xlu1 %v4969_v58, %s4228_s17 }
 0x635   : > { %v1920_v2 = vpop.xlane.xlu1 %1919 }
 0x636   : > { %v1921_v1 = vcvt.f32.s32 %v1920_v2 }
 0x638   : > { %v1924_v32 = vadd.s32 %v1923_v51, %v1921_v1 }
 0x639   : > { %v1337_v29 = vpop.permute.xlu1 %1336 }
 0x63a   : > { %vm1925_vm10 = vcmp.eq.s32.totalorder %v4701_v16, %v1924_v32  ;;  %v1338_v52 = vsel %vm762_vm2, %v1337_v29, 0 }
 0x63b   : > { %v4717_v56 = vsel %vm1925_vm10, 1.0, %v4961_v63  ;;  %v4719_v57 = vand.u32 4294901760, %v1338_v52 }
 0x63c   : > { %vm1928_vm11 = vcmp.gt.f32.partialorder %v4717_v56, 0.0 }
 0x63d   : > { %v1414_v0 = vsub.f32 %v1338_v52, %v4719_v57  ;;  %v4723_v4 = vsel %vm1928_vm11, -inf, %v1904_v20 }
 0x63e   : > { %v1930_v5 = vsel %vm1879_vm3, %v4723_v4, -inf }
 0x63f   : > { %v1415_v46 = vand.u32 4294901760, %v1414_v0  ;;  %1931 = vmax.xlane.f32.xlu0 %v1930_v5 }
 0x641   : > { %v1416_v49 = vsub.f32 %v1414_v0, %v1415_v46 }
 0x643   : > { %v1417_v43 = vand.u32 4294901760, %v1416_v49 }
 0x645   : > { %3576 = vmatmul.mubr.f32.vlgmr.msra.gmra.mrb[2].mxu0 %v1417_v43 }
 0x646   : > { %3939 = vmatpush3.bf16.xpose.msra.mxu0 %v4592_v50  ;;  %3594 = vmatprep.mubr.msk.f32.mxu0 %vm4226_vm0, %v4961_v63 }
 0x647   : > { %3940 = vmatprep.subr.bf16.mxu0 %v4958_v8 }
 0x64e   : > { %3942 = vmatpush3.bf16.xpose.msra.mxu0 %v4604_v34 }
 0x64f   : > { %3943 = vmatprep.subr.bf16.mxu0 %v4958_v8 }
 0x656   : > { %3945 = vmatpush3.bf16.xpose.msra.mxu0 %v4614_v6 }
 0x657   : > { %3946 = vmatprep.subr.bf16.mxu0 %v4958_v8 }
 0x65e   : > { %3948 = vmatpush3.bf16.xpose.msra.mxu0 %v4624_v48 }
 0x65f   : > { %3949 = vmatprep.subr.bf16.mxu0 %v4958_v8 }
 0x665   : > { %3595 = vmatmul.mubr.f32.vlgmr.msra.gmra.mrb[2].mxu0 %v4719_v57 }
 0x666   : > { %3951 = vmatpush3.bf16.xpose.msra.mxu0 %v4630_v53  ;;  %3613 = vmatprep.mubr.msk.f32.mxu0 %vm4226_vm0, %v4961_v63 }
 0x667   : > { %3952 = vmatprep.subr.bf16.mxu0 %v4958_v8 }
 0x66e   : > { %3954 = vmatpush3.bf16.xpose.msra.mxu0 %v4639_v44 }
 0x66f   : > { %3955 = vmatprep.subr.bf16.mxu0 %v4958_v8 }
 0x676   : > { %3957 = vmatpush3.bf16.xpose.msra.mxu0 %v4645_v9 }
 0x677   : > { %3958 = vmatprep.subr.bf16.mxu0 %v4958_v8 }
 0x67e   : > { %3960 = vmatpush3.bf16.xpose.msra.mxu0 %v4651_v10 }
 0x67f   : > { %3961 = vmatprep.subr.bf16.mxu0 %v4958_v8 }
 0x685   : > { %3614 = vmatmul.mubr.f32.vlgmr.msra.gmra.mrb[2].mxu0 %v1414_v0 }
 0x686   : > { %3963 = vmatpush3.bf16.xpose.msra.mxu0 %v4424_v62  ;;  %3632 = vmatprep.mubr.msk.f32.mxu0 %vm4226_vm0, %v4961_v63 }
 0x687   : > { %3964 = vmatprep.subr.bf16.mxu0 %v4958_v8 }
 0x68e   : > { %3966 = vmatpush3.bf16.xpose.msra.mxu0 %v4451_v17 }
 0x68f   : > { %3967 = vmatprep.subr.bf16.mxu0 %v4958_v8 }
 0x696   : > { %3969 = vmatpush3.bf16.xpose.msra.mxu0 %v4473_v30 }
 0x697   : > { %3970 = vmatprep.subr.bf16.mxu0 %v4958_v8 }
 0x69e   : > { %3972 = vmatpush3.bf16.xpose.msra.mxu0 %v4475_v31 }
 0x69f   : > { %3973 = vmatprep.subr.bf16.mxu0 %v4958_v8 }
 0x6a5   : > { %3633 = vmatmul.mubr.f32.vlgmr.msra.gmra.mrb[2].mxu0 %v1415_v46 }
 0x6a6   : > { %3975 = vmatpush3.bf16.xpose.msra.mxu0 %v4480_v33  ;;  %3651 = vmatprep.mubr.msk.f32.mxu0 %vm4226_vm0, %v4961_v63 }
 0x6a7   : > { %3976 = vmatprep.subr.bf16.mxu0 %v4958_v8 }
 0x6ae   : > { %3978 = vmatpush3.bf16.xpose.msra.mxu0 %v4489_v35 }
 0x6af   : > { %3979 = vmatprep.subr.bf16.mxu0 %v4958_v8 }
 0x6b6   : > { %3981 = vmatpush3.bf16.xpose.msra.mxu0 %v4967_v12 }
 0x6b7   : > { %3982 = vmatprep.subr.bf16.mxu0 %v4958_v8 }
 0x6be   : > { %3984 = vmatpush3.bf16.xpose.msra.mxu0 %v4968_v13 }
 0x6bf   : > { %3985 = vmatprep.subr.bf16.mxu0 %v4958_v8 }
 0x6c5   : > { %3652 = vmatmul.mubr.f32.vlgmr.msra.gmra.mrb[2].mxu0 %v4719_v57 }
 0x6c6   : > { %3987 = vmatpush3.bf16.xpose.msra.mxu0 %v4424_v62  ;;  %3670 = vmatprep.mubr.msk.f32.mxu0 %vm4226_vm0, %v4961_v63 }
 0x6c7   : > { %3988 = vmatprep.subr.bf16.mxu0 %v4958_v8 }
 0x6cc   : > { %v1932_v33 = vpop.xlane.xlu0 %1931 }
 0x6cd   : > { %vm1933_vm12 = vcmp.ge.f32.partialorder %v4723_v4, %v1932_v33 }
 0x6ce   : > { %v1934_v35 = vsel %vm1933_vm12, %v4701_v16, 64  ;;  %3990 = vmatpush3.bf16.xpose.msra.mxu0 %v4451_v17 }
 0x6cf   : > { %v1935_v50 = vsel %vm1879_vm3, %v1934_v35, 2147483647  ;;  %3991 = vmatprep.subr.bf16.mxu0 %v4958_v8 }
 0x6d0   : > { %v1937_v34 = vshra.s32 %v1935_v50, 16  ;;  %v1936_v62 = vand.u32 65535, %v1935_v50 }
 0x6d2   : > { %v1939_v6 = vcvt.s32.f32 %v1937_v34 }
 0x6d4   : > { %1940 = vmin.xlane.f32.xlu0 %v1939_v6 }
 0x6d6   : > { %3993 = vmatpush3.bf16.xpose.msra.mxu0 %v4473_v30  ;;  %v1938_v30 = vcvt.s32.f32 %v1936_v62 }
 0x6d7   : > { %3994 = vmatprep.subr.bf16.mxu0 %v4958_v8 }
 0x6de   : > { %3996 = vmatpush3.bf16.xpose.msra.mxu0 %v4475_v31 }
 0x6df   : > { %3997 = vmatprep.subr.bf16.mxu0 %v4958_v8 }
 0x6e5   : > { %3671 = vmatmul.mubr.f32.vlgmr.msra.gmra.mrb[2].mxu0 %v4719_v57 }
 0x6e6   : > { %3999 = vmatpush3.bf16.msra.mxu0 %v4555_v23  ;;  %3689 = vmatprep.mubr.msk.f32.mxu0 %vm4226_vm0, %v4961_v63 }
 0x6e7   : > { %4000 = vmatprep.subr.bf16.mxu0 %v4958_v8 }
 0x6ea   : > { %4002 = vmatpush3.bf16.msra.mxu0 %v4559_v3 }
 0x6eb   : > { %4003 = vmatprep.subr.bf16.mxu0 %v4958_v8 }
 0x6ee   : > { %4005 = vmatpush3.bf16.msra.mxu0 %v4561_v41 }
 0x6ef   : > { %4006 = vmatprep.subr.bf16.mxu0 %v4958_v8 }
 0x6f2   : > { %4008 = vmatpush3.bf16.msra.mxu0 %v4563_v37 }
 0x6f3   : > { %3792 = vmatprep.subr.mxu0 %v4961_v63 }
 0x761   : > { %v1941_v17 = vpop.xlane.xlu0 %1940 }
 0x762   : > { %vm1942_vm13 = vcmp.eq.f32.partialorder %v1939_v6, %v1941_v17  ;;  %v1947_v44 = vcvt.f32.s32 %v1941_v17 }
 0x763   : > { %v1943_v31 = vsel %vm1942_vm13, %v1938_v30, inf }
 0x764   : > { %1944 = vmin.xlane.f32.xlu0 %v1943_v31  ;;  %v1948_v10 = vshll.u32 %v1947_v44, 16 }
 0x7b8   : > { %v1873_v48 = vpop.f32.mrb[2].mxu0 }
 0x7b9   : > { %v3672_v53 = vpop.f32.mrb[3].mxu0  ;;  %v1978_v58 = vmul.f32 %v4707_v19, %v1873_v48  ;;  %v1983_v2 = vmul.f32 %v4717_v56, %v1873_v48 }
 0x7bb   : > { %v1979_v36 = vsel %vm1879_vm3, %v1978_v58, 0.0  ;;  %v1984_v51 = vsel %vm1879_vm3, %v1983_v2, 0.0 }
 0x7f1   : > { %v1945_v9 = vpop.xlane.xlu0 %1944 }
 0x7f2   : > { %v1946_v12 = vcvt.f32.s32 %v1945_v9 }
 0x7f4   : > { %v1949_v13 = vadd.s32 %v1948_v10, %v1946_v12 }
 0x7f6   : > { %vm1950_vm14 = vcmp.eq.s32.totalorder %v4701_v16, %v1949_v13 }
 0x7f7   : > { %v4795_v20 = vsel %vm1950_vm14, 1.0, %v4961_v63 }
 0x7f8   : > { %vm1953_vm15 = vcmp.gt.f32.partialorder %v4795_v20, 0.0  ;;  %v1988_v1 = vmul.f32 %v4795_v20, %v1873_v48 }
 0x7f9   : > { %v1954_v47 = vsel %vm1953_vm15, -inf, %v4723_v4 }
 0x7fa   : > { %v1955_v11 = vsel %vm1879_vm3, %v1954_v47, -inf  ;;  %v1989_v32 = vsel %vm1879_vm3, %v1988_v1, 0.0 }
 0x7fb   : > { %1956 = vmax.xlane.f32.xlu0 %v1955_v11 }
 0x888   : > { %v1957_v7 = vpop.xlane.xlu0 %1956 }
 0x889   : > { %vm1958_vm4 = vcmp.ge.f32.partialorder %v1954_v47, %v1957_v7 }
 0x88a   : > { %v1959_v14 = vsel %vm1958_vm4, %v4701_v16, 64 }
 0x88b   : > { %v1960_v15 = vsel %vm1879_vm3, %v1959_v14, 2147483647 }
 0x88c   : > { %v1962_v21 = vshra.s32 %v1960_v15, 16  ;;  %v1961_v29 = vand.u32 65535, %v1960_v15 }
 0x88e   : > { %v1964_v26 = vcvt.s32.f32 %v1962_v21  ;;  %v1963_v57 = vcvt.s32.f32 %v1961_v29 }
 0x890   : > { %1965 = vmin.xlane.f32.xlu0 %v1964_v26 }
 0x894   : > { %1980 = vadd.xlane.f32.xlu0 %v1979_v36 }
 0x898   : > { %1985 = vadd.xlane.f32.xlu0 %v1984_v51 }
 0x89c   : > { %1990 = vadd.xlane.f32.xlu0 %v1989_v32 }
 0x91d   : > { %v1966_v52 = vpop.xlane.xlu0 %1965 }
 0x91e   : > { %vm1967_vm5 = vcmp.eq.f32.partialorder %v1964_v26, %v1966_v52  ;;  %v1972_v4 = vcvt.f32.s32 %v1966_v52 }
 0x91f   : > { %v1968_v0 = vsel %vm1967_vm5, %v1963_v57, inf }
 0x920   : > { %1969 = vmin.xlane.f32.xlu1 %v1968_v0  ;;  %v1973_v46 = vshll.u32 %v1972_v4, 16 }
 0x921   : > { %v1981_v34 = vpop.xlane.xlu0 %1980 }
 0x922   : > { %v1982_v30 = vmul.f32 0.25, %v1981_v34 }
 0x925   : > { %v1986_v6 = vpop.xlane.xlu0 %1985 }
 0x926   : > { %v1987_v17 = vmul.f32 0.25, %v1986_v6 }
 0x928   : > { %v1998_v53 = vmax.f32 %v1982_v30, %v1987_v17 }
 0x929   : > { %v1991_v62 = vpop.xlane.xlu0 %1990 }
 0x92a   : > { %v1992_v31 = vmul.f32 0.25, %v1991_v62 }
 0x92c   : > { %v1999_v9 = vmax.f32 %v1998_v53, %v1992_v31 }
 0x9ad   : > { %v1970_v5 = vpop.xlane.xlu1 %1969 }
 0x9ae   : > { %v1971_v49 = vcvt.f32.s32 %v1970_v5 }
 0x9b0   : > { %v1974_v43 = vadd.s32 %v1973_v46, %v1971_v49 }
 0x9b2   : > { %vm1975_vm6 = vcmp.eq.s32.totalorder %v4701_v16, %v1974_v43 }
 0x9b3   : > { %v3169_v33 = vsel %vm1975_vm6, 1.0, %v4961_v63 }
 0x9b4   : > { %v1993_v35 = vmul.f32 %v3169_v33, %v1873_v48 }
 0x9b6   : > { %v1994_v50 = vsel %vm1879_vm3, %v1993_v35, 0.0 }
 0x9b7   : > { %1995 = vadd.xlane.f32.xlu0 %v1994_v50 }
 0xa44   : > { %v1996_v44 = vpop.xlane.xlu0 %1995 }
 0xa45   : > { %v1997_v10 = vmul.f32 0.25, %v1996_v44 }
 0xa47   : > { %v2000_v12 = vmax.f32 %v1999_v9, %v1997_v10 }
 0xa49   : > { %v2001_v13 = vsub.f32 %v1982_v30, %v2000_v12  ;;  %v2004_v47 = vsub.f32 %v1987_v17, %v2000_v12  ;;  %v2007_v16 = vsub.f32 %v1992_v31, %v2000_v12  ;;  %v2010_v11 = vsub.f32 %v1997_v10, %v2000_v12 }
 0xa4b   : > { %v2002_v7 = vmul.f32 1.442695, %v2001_v13  ;;  %v2005_v48 = vmul.f32 1.442695, %v2004_v47  ;;  %v2008_v14 = vmul.f32 1.442695, %v2007_v16 }
 0xa4c   : > { %v2011_v15 = vmul.f32 1.442695, %v2010_v11  ;;  %v2568_v13 = vld [vmem:[%s4348_s22] sm:$0xff]  ;;  %s3022_s22 = scalar_lea.sflag [#allocation5], %s235_s20 }
 0xa4d   : > { %4151 = vpow2.f32 %v2002_v7 }
 0xa4e   : > { %4153 = vpow2.f32 %v2005_v48 }
 0xa4f   : > { %4155 = vpow2.f32 %v2008_v14 }
 0xa50   : > { %4157 = vpow2.f32 %v2011_v15 }
 0xa57   : > { %v4152_v21 = vpop.eup %4151 }
 0xa58   : > { %v4154_v26 = vpop.eup %4153 }
 0xa59   : > { %v2013_v58 = vadd.f32 %v4154_v26, %v4152_v21  ;;  %v4156_v36 = vpop.eup %4155 }
 0xa5a   : > { %v4158_v51 = vpop.eup %4157 }
 0xa5b   : > { %v2014_v2 = vadd.f32 %v4156_v36, %v2013_v58 }
 0xa5d   : > { %v2015_v1 = vadd.f32 %v4158_v51, %v2014_v2 }
 0xa5f   : > { %4159 = vrcp.f32 %v2015_v1 }
 0xa69   : > { %v4160_v32 = vpop.eup %4159 }
 0xa6a   : > { %v2017_v29 = vmul.f32 %v4160_v32, %v4152_v21  ;;  %v2019_v52 = vmul.f32 %v4160_v32, %v4154_v26  ;;  %v2022_v57 = vmul.f32 %v4160_v32, %v4156_v36  ;;  %v2025_v0 = vmul.f32 %v4160_v32, %v4158_v51 }
 0xa6c   : > { %v2018_v4 = vmul.f32 %v4707_v19, %v2017_v29  ;;  %v2020_v5 = vmul.f32 %v4717_v56, %v2019_v52  ;;  %v2023_v49 = vmul.f32 %v4795_v20, %v2022_v57  ;;  %v2026_v35 = vmul.f32 %v3169_v33, %v2025_v0 }
 0xa6e   : > { %v2021_v46 = vadd.f32 %v2020_v5, %v2018_v4 }
 0xa70   : > { %v2024_v43 = vadd.f32 %v2023_v49, %v2021_v46 }
 0xa72   : > { %v2027_v50 = vadd.f32 %v2026_v35, %v2024_v43 }
 0xa74   : > { %v2029_v34 = vsel %vm1879_vm3, %v2027_v50, 0 }
 0xa75   : > { %v2104_v6 = vand.u32 4294901760, %v2029_v34 }
 0xa77   : > { %v2105_v62 = vsub.f32 %v2029_v34, %v2104_v6  ;;  %3709 = vmatmul.mubr.f32.vlgmr.msra.gmra.mrb[2].mxu1 %v2104_v6 }
 0xa78   : > { %4023 = vmatpush3.bf16.msra.mxu1 %v4022_v27  ;;  %3727 = vmatprep.mubr.msk.f32.mxu1 %vm4226_vm0, %v4961_v63 }
 0xa79   : > { %4024 = vmatprep.subr.bf16.mxu1 %v4958_v8  ;;  %v2106_v19 = vand.u32 4294901760, %v2105_v62 }
 0xa7b   : > { %v2107_v56 = vsub.f32 %v2105_v62, %v2106_v19 }
 0xa7c   : > { %4026 = vmatpush3.bf16.msra.mxu1 %v4025_v28 }
 0xa7d   : > { %4027 = vmatprep.subr.bf16.mxu1 %v4958_v8  ;;  %v2108_v20 = vand.u32 4294901760, %v2107_v56 }
 0xa7f   : > { %3690 = vmatmul.mubr.f32.vlgmr.msra.gmra.mrb[4].mxu0 %v2108_v20 }
 0xa80   : > { %4029 = vmatpush3.bf16.msra.mxu1 %v4028_v18  ;;  %3794 = vmatprep.mubr.msk.f32.mxu0 %vm4226_vm0, %v4961_v63 }
 0xa81   : > { %4030 = vmatprep.subr.bf16.mxu1 %v4958_v8 }
 0xa84   : > { %4032 = vmatpush3.bf16.msra.mxu1 %v4031_v24 }
 0xa85   : > { %4033 = vmatprep.subr.bf16.mxu1 %v4958_v8 }
 0xa87   : > { %3728 = vmatmul.mubr.f32.vlgmr.msra.gmra.mrb[2].mxu1 %v2105_v62 }
 0xa88   : > { %4035 = vmatpush3.bf16.msra.mxu1 %v4555_v23  ;;  %3746 = vmatprep.mubr.msk.f32.mxu1 %vm4226_vm0, %v4961_v63 }
 0xa89   : > { %4036 = vmatprep.subr.bf16.mxu1 %v4958_v8 }
 0xa8c   : > { %4038 = vmatpush3.bf16.msra.mxu1 %v4559_v3 }
 0xa8d   : > { %4039 = vmatprep.subr.bf16.mxu1 %v4958_v8 }
 0xa90   : > { %4041 = vmatpush3.bf16.msra.mxu1 %v4561_v41 }
 0xa91   : > { %4042 = vmatprep.subr.bf16.mxu1 %v4958_v8 }
 0xa94   : > { %4044 = vmatpush3.bf16.msra.mxu1 %v4563_v37 }
 0xa95   : > { %4045 = vmatprep.subr.bf16.mxu1 %v4958_v8 }
 0xa97   : > { %3747 = vmatmul.mubr.f32.vlgmr.msra.gmra.mrb[2].mxu1 %v2106_v19 }
 0xa98   : > { %4047 = vmatpush3.bf16.msra.mxu1 %v4579_v25  ;;  %3765 = vmatprep.mubr.msk.f32.mxu1 %vm4226_vm0, %v4961_v63 }
 0xa99   : > { %4048 = vmatprep.subr.bf16.mxu1 %v4958_v8 }
 0xa9c   : > { %4050 = vmatpush3.bf16.msra.mxu1 %v4583_v22 }
 0xa9d   : > { %4051 = vmatprep.subr.bf16.mxu1 %v4958_v8 }
 0xaa0   : > { %4053 = vmatpush3.bf16.msra.mxu1 %v4585_v40 }
 0xaa1   : > { %4054 = vmatprep.subr.bf16.mxu1 %v4958_v8 }
 0xaa4   : > { %4056 = vmatpush3.bf16.msra.mxu1 %v4587_v42 }
 0xaa5   : > { %4057 = vmatprep.subr.bf16.mxu1 %v4958_v8 }
 0xaa7   : > { %3766 = vmatmul.mubr.f32.vlgmr.msra.gmra.mrb[2].mxu1 %v2104_v6 }
 0xaa8   : > { %4059 = vmatpush3.bf16.msra.mxu1 %v4555_v23  ;;  %3784 = vmatprep.mubr.msk.f32.mxu1 %vm4226_vm0, %v4961_v63  ;;  %v2569_v23 = vld [vmem:[%s4936_s4] sm:$0xff] }
 0xaa9   : > { %4060 = vmatprep.subr.bf16.mxu1 %v4958_v8  ;;  %v2574_v38 = vand.u32 4294901760, %v2569_v23 }
 0xaac   : > { %4062 = vmatpush3.bf16.msra.mxu1 %v4559_v3  ;;  %v2651_v3 = vsub.f32 %v2569_v23, %v2574_v38 }
 0xaad   : > { %4063 = vmatprep.subr.bf16.mxu1 %v4958_v8 }
 0xaae   : > { %v2652_v39 = vand.u32 4294901760, %v2651_v3 }
 0xab0   : > { %4065 = vmatpush3.bf16.msra.mxu1 %v4561_v41  ;;  %v2653_v54 = vsub.f32 %v2651_v3, %v2652_v39 }
 0xab1   : > { %4066 = vmatprep.subr.bf16.mxu1 %v4958_v8 }
 0xab2   : > { %v2654_v41 = vand.u32 4294901760, %v2653_v54 }
 0xab4   : > { %4068 = vmatpush3.bf16.msra.mxu1 %v4563_v37  ;;  %3793 = vmatpush3.msra.mxu0 %v2654_v41 }
 0xab5   : > { %3787 = vmatprep.subr.mxu1 %v4961_v63  ;;  %3797 = vmatprep.subr.mxu0 %v4961_v63 }
 0xab7   : > { %3785 = vmatmul.mubr.f32.vlgmr.msra.gmra.mrb[2].mxu1 %v2104_v6 }
 0xab8   : > { %3789 = vmatprep.mubr.msk.f32.mxu1 %vm4226_vm0, %v4961_v63  ;;  %3788 = vmatpush3.msra.mxu1 %v2574_v38 }
 0xb52   : > { %v2110_v37 = vpop.f32.mrb[4].mxu0 }
 0xb53   : > { %v3691_v45 = vpop.f32.mrb[5].mxu0 }
 0xb8a   : > { %v2564_v55 = vpop.f32.mrb[2].mxu1 }
 0xb8b   : > { %v4069_v59 = vadd.f32 %v2564_v55, %v2110_v37  ;;  %v3786_v60 = vpop.f32.mrb[3].mxu1 }
 0xb8d   : > { %v2571_v61 = vsel %vm762_vm2, %v4069_v59, 0 }
 0xb8e   : > { %v2639_v27 = vand.u32 4294901760, %v2571_v61 }
 0xb90   : > { %v2640_v28 = vsub.f32 %v2571_v61, %v2639_v27  ;;  %3795 = vmatmul.mubr.f32.vlgmr.msra.gmra.mrb[6].mxu0 %v2639_v27 }
 0xb91   : > { %3798 = vmatpush3.msra.mxu0 %v2651_v3  ;;  %3799 = vmatprep.mubr.msk.f32.mxu0 %vm4226_vm0, %v4961_v63 }
 0xb92   : > { %v2641_v18 = vand.u32 4294901760, %v2640_v28  ;;  %3802 = vmatprep.subr.mxu0 %v4961_v63 }
 0xb94   : > { %3800 = vmatmul.mubr.f32.vlgmr.msra.gmra.mrb[8].mxu0 %v2640_v28  ;;  %v2642_v24 = vsub.f32 %v2640_v28, %v2641_v18 }
 0xb95   : > { %3803 = vmatpush3.msra.mxu0 %v2574_v38  ;;  %3804 = vmatprep.mubr.msk.f32.mxu0 %vm4226_vm0, %v4961_v63 }
 0xb96   : > { %3807 = vmatprep.subr.mxu0 %v4961_v63  ;;  %v2643_v25 = vand.u32 4294901760, %v2642_v24 }
 0xb98   : > { %3790 = vmatmul.mubr.f32.vlgmr.msra.gmra.mrb[4].mxu1 %v2643_v25  ;;  %3805 = vmatmul.mubr.f32.vlgmr.msra.gmra.mrb[10].mxu0 %v2641_v18 }
 0xb99   : > { %3808 = vmatpush3.msra.mxu0 %v2652_v39  ;;  %3809 = vmatprep.mubr.msk.f32.mxu0 %vm4226_vm0, %v4961_v63 }
 0xb9a   : > { %3812 = vmatprep.subr.mxu0 %v4961_v63 }
 0xb9c   : > { %3810 = vmatmul.mubr.f32.vlgmr.msra.gmra.mrb[12].mxu0 %v2639_v27 }
 0xb9d   : > { %3813 = vmatpush3.msra.mxu0 %v2574_v38  ;;  %3814 = vmatprep.mubr.msk.f32.mxu0 %vm4226_vm0, %v4961_v63 }
 0xba0   : > { %3815 = vmatmul.mubr.f32.vlgmr.msra.gmra.mrb[14].mxu0 %v2639_v27 }
 0xc63   : > { %v2721_v8 = vpop.f32.mrb[6].mxu0 }
 0xc64   : > { %v3796_v22 = vpop.f32.mrb[7].mxu0 }
 0xc67   : > { %v2795_v40 = vpop.f32.mrb[8].mxu0 }
 0xc68   : > { %v3801_v42 = vpop.f32.mrb[9].mxu0 }
 0xc6b   : > { %v2645_v33 = vpop.f32.mrb[4].mxu1  ;;  %v2869_v17 = vpop.f32.mrb[10].mxu0 }
 0xc6c   : > { %v2722_v30 = vadd.f32 %v2721_v8, %v2645_v33  ;;  %v3791_v31 = vpop.f32.mrb[5].mxu1  ;;  %v3806_v53 = vpop.f32.mrb[11].mxu0 }
 0xc6e   : > { %v2796_v44 = vadd.f32 %v2795_v40, %v2722_v30 }
 0xc6f   : > { %v2943_v9 = vpop.f32.mrb[12].mxu0 }
 0xc70   : > { %v2870_v10 = vadd.f32 %v2869_v17, %v2796_v44  ;;  %v3811_v12 = vpop.f32.mrb[13].mxu0 }
 0xc72   : > { %v2944_v63 = vadd.f32 %v2943_v9, %v2870_v10 }
 0xc73   : > { %v3015_v47 = vpop.f32.mrb[14].mxu0 }
 0xc74   : > { %v3016_v16 = vadd.f32 %v3015_v47, %v2944_v63  ;;  %v3816_v11 = vpop.f32.mrb[15].mxu0 }
 0xc76   : > { %v3019_v7 = vadd.f32 %v3016_v16, %v2568_v13 }
 0xc78   : > { %3020 = vst.msk [vmem:[%s237_s29] sm:$0xff] %vm273_vm1, %v3019_v7 }
 0xc79   : > { %4174 = shalt.err (!%p4171_p4)
}
 0xc7a   : > { %s4175_s16 = scalar_lea.hbm %s4889_s12, 128  ;;  %s4179_s19 = scalar_lea.hbm %s4937_s5, 256 }
 0xc7b   : > { %p4176_p7 = scmp.ne.s32.totalorder %s4889_s12, %s4175_s16  ;;  %p4180_p10 = scmp.lt.u32.totalorder %s4889_s12, %s4937_s5 }
 0xc7c   : > { %p4181_p11 = scmp.lt.u32.totalorder %s4179_s19, %s4175_s16  ;;  %p4183_p13 = scmp.lt.u32.totalorder %s4175_s16, %s4889_s12 }
 0xc7d   : > { %p4177_p8 = pnand %p4176_p7, %p4306_p5 }
 0xc7e   : > { %p4182_p12 = por %p4181_p11, %p4180_p10 }
 0xc7f   : > { %p4178_p9 = pneg %p4177_p8 }
 0xc80   : > { %p4184_p0 = por %p4183_p13, %p4182_p12 }
 0xc82   : > { %p4185_p1 = pnand %p4184_p0, %p4178_p9 }
 0xc84   : > { %4188 = shalt.err (!%p4185_p1)
}
 0xc85   : > { %4108 = dma.vmem_to_hbm [thread:$0]  (%p4306_p5), %s4891_s30, 128, %s4889_s12, %s3022_s22  }
 0xc86 PF: > { %p4114_p2 = scmp.ge.s32.totalorder %s4223_s26, 2  ;;  %s3060_s27 = sand.u32 1, %s4211_s23  }
 0xc87   : > { %s3061_s29 = scalar_lea.sflag [#allocation5], %s3060_s27 }
 0xc88   : > { %p4111_p3 = pnand %p4114_p2, %p4310_p6 }
 0xc8a   : > { %4206 = dma.done.wait (!%p4111_p3), %s3061_s29, 128  }
 0xc8b   : > { %4208 = vsyncadd (!%p4111_p3), %s3061_s29, 4294967168  ;;  %p18_p4 = scmp.ge.s32.totalorder %s4293_s28, 4   ;;  %s4970_s23 = smov %s4215_s24 }
 0xc8c   : > { %s4971_s24 = smov %s4219_s25  ;;  %s4972_s25 = smov %s4304_s7 }
 0xc8d   : > { %s4973_s26 = smov %s4293_s28  ;;  %20 = sbr.rel (!%p18_p4) target bundleno = 5 (0x5), region = 86 }
 0xc94   :  { %3078 = vsyncpa [#allocation5], 1 }
 0xc95   :  { %3080 = vsyncpa [#allocation5 + $0x1], 1 }

</bundles_post_ra>
